<compile_context>
chip_gen: v7x
topology: tpu7x:2x2x1
jax: 0.10.0
libtpu: 0.0.40
codegen_flags: <defaults>
</compile_context>

<pallas_src>
import jax
import jax.numpy as jnp
from jax.experimental import pallas as pl
from jax.experimental.pallas import tpu as pltpu


def _xunit_kernel(x_ref, w_ref, b_ref, o_ref, xp_ref):
    # x_ref : (1, 1, H, W)  VMEM  raw input plane (one batch, one channel)
    # w_ref : (C, K*K)      SMEM  depthwise filter taps, row c = channel c
    # b_ref : (C,)          SMEM  conv bias
    # o_ref : (1, 1, H, W)  VMEM  output plane
    # xp_ref: (Hp, Wp)      VMEM  f32 scratch: zero-padded ReLU(x)
    _, _, H, W = o_ref.shape
    Hp, _ = xp_ref.shape
    K = Hp - H + 1              # odd kernel size; 'same' padding = K // 2
    pad = K // 2
    c = pl.program_id(1)

    # Gate operand: the raw (pre-ReLU) input plane.
    x = x_ref[0, 0, :, :].astype(jnp.float32)

    # In-kernel zero padding + ReLU into the scratch plane.
    xp_ref[...] = jnp.zeros_like(xp_ref)
    xp_ref[pad:pad + H, pad:pad + W] = jnp.maximum(x, 0.0)

    # Depthwise KxK conv = K*K scalar*plane MACs on the VPU (no MXU needed);
    # bias is folded into the accumulator init via an SMEM scalar broadcast.
    acc = jnp.full((H, W), b_ref[c], dtype=jnp.float32)
    for kh in range(K):
        for kw in range(K):
            acc = acc + xp_ref[kh:kh + H, kw:kw + W] * w_ref[c, kh * K + kw]

    # sigmoid(z) = 0.5 * (tanh(z/2) + 1): tanh runs on the EUP slot, so the
    # gate costs no f32 divide on the (otherwise busy) VALU.
    a = 0.5 * (jnp.tanh(0.5 * acc) + 1.0)
    o_ref[0, 0, :, :] = (x * a).astype(o_ref.dtype)


def xunit(x: jax.Array, w_oihw: jax.Array, b: jax.Array) -> jax.Array:
    """xUnit forward: x * sigmoid(depthwise_conv(relu(x)) + bias).

    x      : (N, C, H, W)  activations (PyTorch NCHW layout, consumed as-is)
    w_oihw : (C, 1, K, K)  depthwise Conv2d weight (groups = C)
    b      : (C,)          Conv2d bias
    """
    N, C, H, W = x.shape
    K = w_oihw.shape[-1]
    assert K % 2 == 1, "xUnit uses padding = K // 2; this kernel assumes odd K"
    pad = K // 2
    Hp, Wp = H + 2 * pad, W + 2 * pad

    # (C, 1, K, K) -> (C, K*K): tiny per-channel tap table, lives in SMEM.
    w_taps = w_oihw.reshape(C, K * K)

    return pl.pallas_call(
        _xunit_kernel,
        out_shape=jax.ShapeDtypeStruct((N, C, H, W), x.dtype),
        grid_spec=pltpu.PrefetchScalarGridSpec(
            num_scalar_prefetch=0,
            grid=(N, C),
            in_specs=[
                pl.BlockSpec((1, 1, H, W), lambda n, c: (n, c, 0, 0)),
                pl.BlockSpec(memory_space=pltpu.MemorySpace.SMEM),
                pl.BlockSpec(memory_space=pltpu.MemorySpace.SMEM),
            ],
            out_specs=pl.BlockSpec((1, 1, H, W), lambda n, c: (n, c, 0, 0)),
            scratch_shapes=[pltpu.VMEM((Hp, Wp), jnp.float32)],
        ),
        compiler_params=pltpu.CompilerParams(
            dimension_semantics=("parallel", "parallel"),
        ),
    )(x, w_taps, b)


def _xunit_ref(x, w_oihw, b):
    """Pure-JAX reference of the PyTorch xUnit forward."""
    C = x.shape[1]
    K = w_oihw.shape[-1]
    pad = K // 2
    a = jnp.maximum(x, 0.0)
    a = jax.lax.conv_general_dilated(
        a, w_oihw,
        window_strides=(1, 1),
        padding=[(pad, pad), (pad, pad)],
        dimension_numbers=("NCHW", "OIHW", "NCHW"),
        feature_group_count=C,
    )
    a = a + b.reshape(1, C, 1, 1)
    a = jax.nn.sigmoid(a)
    return x * a


if __name__ == "__main__":
    key = jax.random.PRNGKey(0)
    kx, kw, kb = jax.random.split(key, 3)

    # Small shapes consistent with the module: NCHW activations,
    # num_features = C = 4, kernel_size = 7 (padding 3), depthwise groups = C.
    N, C, H, W = 2, 4, 16, 16
    K = 7
    x = jax.random.normal(kx, (N, C, H, W), dtype=jnp.float32)
    w = jax.random.normal(kw, (C, 1, K, K), dtype=jnp.float32) * 0.1
    b = jax.random.normal(kb, (C,), dtype=jnp.float32) * 0.1

    y = xunit(x, w, b)
    jax.block_until_ready(y)

    y_ref = _xunit_ref(x, w, b)
    assert y.shape == x.shape, (y.shape, x.shape)
    assert y.dtype == x.dtype, (y.dtype, x.dtype)
    max_err = float(jnp.max(jnp.abs(y - y_ref)))
    # 1e-4 tolerance: allows for the EUP tanh-based sigmoid vs. XLA's sigmoid
    # and for the 49-term f32 accumulation order differing from the reference.
    assert max_err < 1e-4, f"max abs err {max_err}"

    print("KERNEL_OK")
</pallas_src>

<mosaic_0001>
module attributes {stable_mosaic.version = 11 : i64} {
  func.func @_xunit_kernel(%arg0: i32, %arg1: i32, %arg2: memref<1x1x16x16xf32, #tpu.memory_space<vmem>>, %arg3: memref<4x49xf32, #tpu.memory_space<smem>>, %arg4: memref<4xf32, #tpu.memory_space<smem>>, %arg5: memref<1x1x16x16xf32, #tpu.memory_space<vmem>>, %arg6: memref<22x22xf32, #tpu.memory_space<vmem>>) attributes {dimension_semantics = [#tpu.dimension_semantics<parallel>, #tpu.dimension_semantics<parallel>], iteration_bounds = array<i64: 2, 4>, scalar_prefetch = 0 : i64, scratch_operands = 1 : i64, tpu.core_type = #tpu.core_type<tc>, window_params = [{transform_indices = @transform_0, window_bounds = array<i64: 1, 1, 16, 16>}, {transform_indices = @transform_1, window_bounds = array<i64: 4, 49>}, {transform_indices = @transform_2, window_bounds = array<i64: 4>}, {transform_indices = @transform_3, window_bounds = array<i64: 1, 1, 16, 16>}]} {
    %c0 = arith.constant 0 : index
    %c0_0 = arith.constant 0 : index
    %c0_1 = arith.constant 0 : index
    %c0_2 = arith.constant 0 : index
    %0 = vector.load %arg2[%c0, %c0_0, %c0_1, %c0_2] : memref<1x1x16x16xf32, #tpu.memory_space<vmem>>, vector<1x1x16x16xf32>
    %1 = vector.shape_cast %0 : vector<1x1x16x16xf32> to vector<16x16xf32>
    %cst = arith.constant 0.000000e+00 : f32
    %2 = vector.broadcast %cst : f32 to vector<22x22xf32>
    %c0_3 = arith.constant 0 : index
    %c0_4 = arith.constant 0 : index
    %3 = vector.load %arg6[%c0_3, %c0_4] : memref<22x22xf32, #tpu.memory_space<vmem>>, vector<22x22xf32>
    tpu.vector_store %arg6[%c0_3, %c0_4], %2 {strides = array<i32>} : memref<22x22xf32, #tpu.memory_space<vmem>>, vector<22x22xf32>,
    %cst_5 = arith.constant 0.000000e+00 : f32
    %4 = vector.broadcast %cst_5 : f32 to vector<16x16xf32>
    %5 = arith.maximumf %1, %4 : vector<16x16xf32>
    %c3 = arith.constant 3 : index
    %c3_6 = arith.constant 3 : index
    %6 = vector.load %arg6[%c3, %c3_6] : memref<22x22xf32, #tpu.memory_space<vmem>>, vector<16x16xf32>
    tpu.vector_store %arg6[%c3, %c3_6], %5 {strides = array<i32>} : memref<22x22xf32, #tpu.memory_space<vmem>>, vector<16x16xf32>,
    %7 = arith.index_cast %arg1 : i32 to index
    %8 = memref.load %arg4[%7] : memref<4xf32, #tpu.memory_space<smem>>
    %9 = vector.broadcast %8 : f32 to vector<16x16xf32>
    %c0_7 = arith.constant 0 : index
    %c0_8 = arith.constant 0 : index
    %10 = vector.load %arg6[%c0_7, %c0_8] : memref<22x22xf32, #tpu.memory_space<vmem>>, vector<16x16xf32>
    %11 = arith.index_cast %arg1 : i32 to index
    %c0_9 = arith.constant 0 : index
    %12 = memref.load %arg3[%11, %c0_9] : memref<4x49xf32, #tpu.memory_space<smem>>
    %13 = vector.broadcast %12 : f32 to vector<16x16xf32>
    %14 = arith.mulf %10, %13 : vector<16x16xf32>
    %15 = arith.addf %9, %14 : vector<16x16xf32>
    %c0_10 = arith.constant 0 : index
    %c1 = arith.constant 1 : index
    %16 = vector.load %arg6[%c0_10, %c1] : memref<22x22xf32, #tpu.memory_space<vmem>>, vector<16x16xf32>
    %17 = arith.index_cast %arg1 : i32 to index
    %c1_11 = arith.constant 1 : index
    %18 = memref.load %arg3[%17, %c1_11] : memref<4x49xf32, #tpu.memory_space<smem>>
    %19 = vector.broadcast %18 : f32 to vector<16x16xf32>
    %20 = arith.mulf %16, %19 : vector<16x16xf32>
    %21 = arith.addf %15, %20 : vector<16x16xf32>
    %c0_12 = arith.constant 0 : index
    %c2 = arith.constant 2 : index
    %22 = vector.load %arg6[%c0_12, %c2] : memref<22x22xf32, #tpu.memory_space<vmem>>, vector<16x16xf32>
    %23 = arith.index_cast %arg1 : i32 to index
    %c2_13 = arith.constant 2 : index
    %24 = memref.load %arg3[%23, %c2_13] : memref<4x49xf32, #tpu.memory_space<smem>>
    %25 = vector.broadcast %24 : f32 to vector<16x16xf32>
    %26 = arith.mulf %22, %25 : vector<16x16xf32>
    %27 = arith.addf %21, %26 : vector<16x16xf32>
    %c0_14 = arith.constant 0 : index
    %c3_15 = arith.constant 3 : index
    %28 = vector.load %arg6[%c0_14, %c3_15] : memref<22x22xf32, #tpu.memory_space<vmem>>, vector<16x16xf32>
    %29 = arith.index_cast %arg1 : i32 to index
    %c3_16 = arith.constant 3 : index
    %30 = memref.load %arg3[%29, %c3_16] : memref<4x49xf32, #tpu.memory_space<smem>>
    %31 = vector.broadcast %30 : f32 to vector<16x16xf32>
    %32 = arith.mulf %28, %31 : vector<16x16xf32>
    %33 = arith.addf %27, %32 : vector<16x16xf32>
    %c0_17 = arith.constant 0 : index
    %c4 = arith.constant 4 : index
    %34 = vector.load %arg6[%c0_17, %c4] : memref<22x22xf32, #tpu.memory_space<vmem>>, vector<16x16xf32>
    %35 = arith.index_cast %arg1 : i32 to index
    %c4_18 = arith.constant 4 : index
    %36 = memref.load %arg3[%35, %c4_18] : memref<4x49xf32, #tpu.memory_space<smem>>
    %37 = vector.broadcast %36 : f32 to vector<16x16xf32>
    %38 = arith.mulf %34, %37 : vector<16x16xf32>
    %39 = arith.addf %33, %38 : vector<16x16xf32>
    %c0_19 = arith.constant 0 : index
    %c5 = arith.constant 5 : index
    %40 = vector.load %arg6[%c0_19, %c5] : memref<22x22xf32, #tpu.memory_space<vmem>>, vector<16x16xf32>
    %41 = arith.index_cast %arg1 : i32 to index
    %c5_20 = arith.constant 5 : index
    %42 = memref.load %arg3[%41, %c5_20] : memref<4x49xf32, #tpu.memory_space<smem>>
    %43 = vector.broadcast %42 : f32 to vector<16x16xf32>
    %44 = arith.mulf %40, %43 : vector<16x16xf32>
    %45 = arith.addf %39, %44 : vector<16x16xf32>
    %c0_21 = arith.constant 0 : index
    %c6 = arith.constant 6 : index
    %46 = vector.load %arg6[%c0_21, %c6] : memref<22x22xf32, #tpu.memory_space<vmem>>, vector<16x16xf32>
    %47 = arith.index_cast %arg1 : i32 to index
    %c6_22 = arith.constant 6 : index
    %48 = memref.load %arg3[%47, %c6_22] : memref<4x49xf32, #tpu.memory_space<smem>>
    %49 = vector.broadcast %48 : f32 to vector<16x16xf32>
    %50 = arith.mulf %46, %49 : vector<16x16xf32>
    %51 = arith.addf %45, %50 : vector<16x16xf32>
    %c1_23 = arith.constant 1 : index
    %c0_24 = arith.constant 0 : index
    %52 = vector.load %arg6[%c1_23, %c0_24] : memref<22x22xf32, #tpu.memory_space<vmem>>, vector<16x16xf32>
    %53 = arith.index_cast %arg1 : i32 to index
    %c7 = arith.constant 7 : index
    %54 = memref.load %arg3[%53, %c7] : memref<4x49xf32, #tpu.memory_space<smem>>
    %55 = vector.broadcast %54 : f32 to vector<16x16xf32>
    %56 = arith.mulf %52, %55 : vector<16x16xf32>
    %57 = arith.addf %51, %56 : vector<16x16xf32>
    %c1_25 = arith.constant 1 : index
    %c1_26 = arith.constant 1 : index
    %58 = vector.load %arg6[%c1_25, %c1_26] : memref<22x22xf32, #tpu.memory_space<vmem>>, vector<16x16xf32>
    %59 = arith.index_cast %arg1 : i32 to index
    %c8 = arith.constant 8 : index
    %60 = memref.load %arg3[%59, %c8] : memref<4x49xf32, #tpu.memory_space<smem>>
    %61 = vector.broadcast %60 : f32 to vector<16x16xf32>
    %62 = arith.mulf %58, %61 : vector<16x16xf32>
    %63 = arith.addf %57, %62 : vector<16x16xf32>
    %c1_27 = arith.constant 1 : index
    %c2_28 = arith.constant 2 : index
    %64 = vector.load %arg6[%c1_27, %c2_28] : memref<22x22xf32, #tpu.memory_space<vmem>>, vector<16x16xf32>
    %65 = arith.index_cast %arg1 : i32 to index
    %c9 = arith.constant 9 : index
    %66 = memref.load %arg3[%65, %c9] : memref<4x49xf32, #tpu.memory_space<smem>>
    %67 = vector.broadcast %66 : f32 to vector<16x16xf32>
    %68 = arith.mulf %64, %67 : vector<16x16xf32>
    %69 = arith.addf %63, %68 : vector<16x16xf32>
    %c1_29 = arith.constant 1 : index
    %c3_30 = arith.constant 3 : index
    %70 = vector.load %arg6[%c1_29, %c3_30] : memref<22x22xf32, #tpu.memory_space<vmem>>, vector<16x16xf32>
    %71 = arith.index_cast %arg1 : i32 to index
    %c10 = arith.constant 10 : index
    %72 = memref.load %arg3[%71, %c10] : memref<4x49xf32, #tpu.memory_space<smem>>
    %73 = vector.broadcast %72 : f32 to vector<16x16xf32>
    %74 = arith.mulf %70, %73 : vector<16x16xf32>
    %75 = arith.addf %69, %74 : vector<16x16xf32>
    %c1_31 = arith.constant 1 : index
    %c4_32 = arith.constant 4 : index
    %76 = vector.load %arg6[%c1_31, %c4_32] : memref<22x22xf32, #tpu.memory_space<vmem>>, vector<16x16xf32>
    %77 = arith.index_cast %arg1 : i32 to index
    %c11 = arith.constant 11 : index
    %78 = memref.load %arg3[%77, %c11] : memref<4x49xf32, #tpu.memory_space<smem>>
    %79 = vector.broadcast %78 : f32 to vector<16x16xf32>
    %80 = arith.mulf %76, %79 : vector<16x16xf32>
    %81 = arith.addf %75, %80 : vector<16x16xf32>
    %c1_33 = arith.constant 1 : index
    %c5_34 = arith.constant 5 : index
    %82 = vector.load %arg6[%c1_33, %c5_34] : memref<22x22xf32, #tpu.memory_space<vmem>>, vector<16x16xf32>
    %83 = arith.index_cast %arg1 : i32 to index
    %c12 = arith.constant 12 : index
    %84 = memref.load %arg3[%83, %c12] : memref<4x49xf32, #tpu.memory_space<smem>>
    %85 = vector.broadcast %84 : f32 to vector<16x16xf32>
    %86 = arith.mulf %82, %85 : vector<16x16xf32>
    %87 = arith.addf %81, %86 : vector<16x16xf32>
    %c1_35 = arith.constant 1 : index
    %c6_36 = arith.constant 6 : index
    %88 = vector.load %arg6[%c1_35, %c6_36] : memref<22x22xf32, #tpu.memory_space<vmem>>, vector<16x16xf32>
    %89 = arith.index_cast %arg1 : i32 to index
    %c13 = arith.constant 13 : index
    %90 = memref.load %arg3[%89, %c13] : memref<4x49xf32, #tpu.memory_space<smem>>
    %91 = vector.broadcast %90 : f32 to vector<16x16xf32>
    %92 = arith.mulf %88, %91 : vector<16x16xf32>
    %93 = arith.addf %87, %92 : vector<16x16xf32>
    %c2_37 = arith.constant 2 : index
    %c0_38 = arith.constant 0 : index
    %94 = vector.load %arg6[%c2_37, %c0_38] : memref<22x22xf32, #tpu.memory_space<vmem>>, vector<16x16xf32>
    %95 = arith.index_cast %arg1 : i32 to index
    %c14 = arith.constant 14 : index
    %96 = memref.load %arg3[%95, %c14] : memref<4x49xf32, #tpu.memory_space<smem>>
    %97 = vector.broadcast %96 : f32 to vector<16x16xf32>
    %98 = arith.mulf %94, %97 : vector<16x16xf32>
    %99 = arith.addf %93, %98 : vector<16x16xf32>
    %c2_39 = arith.constant 2 : index
    %c1_40 = arith.constant 1 : index
    %100 = vector.load %arg6[%c2_39, %c1_40] : memref<22x22xf32, #tpu.memory_space<vmem>>, vector<16x16xf32>
    %101 = arith.index_cast %arg1 : i32 to index
    %c15 = arith.constant 15 : index
    %102 = memref.load %arg3[%101, %c15] : memref<4x49xf32, #tpu.memory_space<smem>>
    %103 = vector.broadcast %102 : f32 to vector<16x16xf32>
    %104 = arith.mulf %100, %103 : vector<16x16xf32>
    %105 = arith.addf %99, %104 : vector<16x16xf32>
    %c2_41 = arith.constant 2 : index
    %c2_42 = arith.constant 2 : index
    %106 = vector.load %arg6[%c2_41, %c2_42] : memref<22x22xf32, #tpu.memory_space<vmem>>, vector<16x16xf32>
    %107 = arith.index_cast %arg1 : i32 to index
    %c16 = arith.constant 16 : index
    %108 = memref.load %arg3[%107, %c16] : memref<4x49xf32, #tpu.memory_space<smem>>
    %109 = vector.broadcast %108 : f32 to vector<16x16xf32>
    %110 = arith.mulf %106, %109 : vector<16x16xf32>
    %111 = arith.addf %105, %110 : vector<16x16xf32>
    %c2_43 = arith.constant 2 : index
    %c3_44 = arith.constant 3 : index
    %112 = vector.load %arg6[%c2_43, %c3_44] : memref<22x22xf32, #tpu.memory_space<vmem>>, vector<16x16xf32>
    %113 = arith.index_cast %arg1 : i32 to index
    %c17 = arith.constant 17 : index
    %114 = memref.load %arg3[%113, %c17] : memref<4x49xf32, #tpu.memory_space<smem>>
    %115 = vector.broadcast %114 : f32 to vector<16x16xf32>
    %116 = arith.mulf %112, %115 : vector<16x16xf32>
    %117 = arith.addf %111, %116 : vector<16x16xf32>
    %c2_45 = arith.constant 2 : index
    %c4_46 = arith.constant 4 : index
    %118 = vector.load %arg6[%c2_45, %c4_46] : memref<22x22xf32, #tpu.memory_space<vmem>>, vector<16x16xf32>
    %119 = arith.index_cast %arg1 : i32 to index
    %c18 = arith.constant 18 : index
    %120 = memref.load %arg3[%119, %c18] : memref<4x49xf32, #tpu.memory_space<smem>>
    %121 = vector.broadcast %120 : f32 to vector<16x16xf32>
    %122 = arith.mulf %118, %121 : vector<16x16xf32>
    %123 = arith.addf %117, %122 : vector<16x16xf32>
    %c2_47 = arith.constant 2 : index
    %c5_48 = arith.constant 5 : index
    %124 = vector.load %arg6[%c2_47, %c5_48] : memref<22x22xf32, #tpu.memory_space<vmem>>, vector<16x16xf32>
    %125 = arith.index_cast %arg1 : i32 to index
    %c19 = arith.constant 19 : index
    %126 = memref.load %arg3[%125, %c19] : memref<4x49xf32, #tpu.memory_space<smem>>
    %127 = vector.broadcast %126 : f32 to vector<16x16xf32>
    %128 = arith.mulf %124, %127 : vector<16x16xf32>
    %129 = arith.addf %123, %128 : vector<16x16xf32>
    %c2_49 = arith.constant 2 : index
    %c6_50 = arith.constant 6 : index
    %130 = vector.load %arg6[%c2_49, %c6_50] : memref<22x22xf32, #tpu.memory_space<vmem>>, vector<16x16xf32>
    %131 = arith.index_cast %arg1 : i32 to index
    %c20 = arith.constant 20 : index
    %132 = memref.load %arg3[%131, %c20] : memref<4x49xf32, #tpu.memory_space<smem>>
    %133 = vector.broadcast %132 : f32 to vector<16x16xf32>
    %134 = arith.mulf %130, %133 : vector<16x16xf32>
    %135 = arith.addf %129, %134 : vector<16x16xf32>
    %c3_51 = arith.constant 3 : index
    %c0_52 = arith.constant 0 : index
    %136 = vector.load %arg6[%c3_51, %c0_52] : memref<22x22xf32, #tpu.memory_space<vmem>>, vector<16x16xf32>
    %137 = arith.index_cast %arg1 : i32 to index
    %c21 = arith.constant 21 : index
    %138 = memref.load %arg3[%137, %c21] : memref<4x49xf32, #tpu.memory_space<smem>>
    %139 = vector.broadcast %138 : f32 to vector<16x16xf32>
    %140 = arith.mulf %136, %139 : vector<16x16xf32>
    %141 = arith.addf %135, %140 : vector<16x16xf32>
    %c3_53 = arith.constant 3 : index
    %c1_54 = arith.constant 1 : index
    %142 = vector.load %arg6[%c3_53, %c1_54] : memref<22x22xf32, #tpu.memory_space<vmem>>, vector<16x16xf32>
    %143 = arith.index_cast %arg1 : i32 to index
    %c22 = arith.constant 22 : index
    %144 = memref.load %arg3[%143, %c22] : memref<4x49xf32, #tpu.memory_space<smem>>
    %145 = vector.broadcast %144 : f32 to vector<16x16xf32>
    %146 = arith.mulf %142, %145 : vector<16x16xf32>
    %147 = arith.addf %141, %146 : vector<16x16xf32>
    %c3_55 = arith.constant 3 : index
    %c2_56 = arith.constant 2 : index
    %148 = vector.load %arg6[%c3_55, %c2_56] : memref<22x22xf32, #tpu.memory_space<vmem>>, vector<16x16xf32>
    %149 = arith.index_cast %arg1 : i32 to index
    %c23 = arith.constant 23 : index
    %150 = memref.load %arg3[%149, %c23] : memref<4x49xf32, #tpu.memory_space<smem>>
    %151 = vector.broadcast %150 : f32 to vector<16x16xf32>
    %152 = arith.mulf %148, %151 : vector<16x16xf32>
    %153 = arith.addf %147, %152 : vector<16x16xf32>
    %c3_57 = arith.constant 3 : index
    %c3_58 = arith.constant 3 : index
    %154 = vector.load %arg6[%c3_57, %c3_58] : memref<22x22xf32, #tpu.memory_space<vmem>>, vector<16x16xf32>
    %155 = arith.index_cast %arg1 : i32 to index
    %c24 = arith.constant 24 : index
    %156 = memref.load %arg3[%155, %c24] : memref<4x49xf32, #tpu.memory_space<smem>>
    %157 = vector.broadcast %156 : f32 to vector<16x16xf32>
    %158 = arith.mulf %154, %157 : vector<16x16xf32>
    %159 = arith.addf %153, %158 : vector<16x16xf32>
    %c3_59 = arith.constant 3 : index
    %c4_60 = arith.constant 4 : index
    %160 = vector.load %arg6[%c3_59, %c4_60] : memref<22x22xf32, #tpu.memory_space<vmem>>, vector<16x16xf32>
    %161 = arith.index_cast %arg1 : i32 to index
    %c25 = arith.constant 25 : index
    %162 = memref.load %arg3[%161, %c25] : memref<4x49xf32, #tpu.memory_space<smem>>
    %163 = vector.broadcast %162 : f32 to vector<16x16xf32>
    %164 = arith.mulf %160, %163 : vector<16x16xf32>
    %165 = arith.addf %159, %164 : vector<16x16xf32>
    %c3_61 = arith.constant 3 : index
    %c5_62 = arith.constant 5 : index
    %166 = vector.load %arg6[%c3_61, %c5_62] : memref<22x22xf32, #tpu.memory_space<vmem>>, vector<16x16xf32>
    %167 = arith.index_cast %arg1 : i32 to index
    %c26 = arith.constant 26 : index
    %168 = memref.load %arg3[%167, %c26] : memref<4x49xf32, #tpu.memory_space<smem>>
    %169 = vector.broadcast %168 : f32 to vector<16x16xf32>
    %170 = arith.mulf %166, %169 : vector<16x16xf32>
    %171 = arith.addf %165, %170 : vector<16x16xf32>
    %c3_63 = arith.constant 3 : index
    %c6_64 = arith.constant 6 : index
    %172 = vector.load %arg6[%c3_63, %c6_64] : memref<22x22xf32, #tpu.memory_space<vmem>>, vector<16x16xf32>
    %173 = arith.index_cast %arg1 : i32 to index
    %c27 = arith.constant 27 : index
    %174 = memref.load %arg3[%173, %c27] : memref<4x49xf32, #tpu.memory_space<smem>>
    %175 = vector.broadcast %174 : f32 to vector<16x16xf32>
    %176 = arith.mulf %172, %175 : vector<16x16xf32>
    %177 = arith.addf %171, %176 : vector<16x16xf32>
    %c4_65 = arith.constant 4 : index
    %c0_66 = arith.constant 0 : index
    %178 = vector.load %arg6[%c4_65, %c0_66] : memref<22x22xf32, #tpu.memory_space<vmem>>, vector<16x16xf32>
    %179 = arith.index_cast %arg1 : i32 to index
    %c28 = arith.constant 28 : index
    %180 = memref.load %arg3[%179, %c28] : memref<4x49xf32, #tpu.memory_space<smem>>
    %181 = vector.broadcast %180 : f32 to vector<16x16xf32>
    %182 = arith.mulf %178, %181 : vector<16x16xf32>
    %183 = arith.addf %177, %182 : vector<16x16xf32>
    %c4_67 = arith.constant 4 : index
    %c1_68 = arith.constant 1 : index
    %184 = vector.load %arg6[%c4_67, %c1_68] : memref<22x22xf32, #tpu.memory_space<vmem>>, vector<16x16xf32>
    %185 = arith.index_cast %arg1 : i32 to index
    %c29 = arith.constant 29 : index
    %186 = memref.load %arg3[%185, %c29] : memref<4x49xf32, #tpu.memory_space<smem>>
    %187 = vector.broadcast %186 : f32 to vector<16x16xf32>
    %188 = arith.mulf %184, %187 : vector<16x16xf32>
    %189 = arith.addf %183, %188 : vector<16x16xf32>
    %c4_69 = arith.constant 4 : index
    %c2_70 = arith.constant 2 : index
    %190 = vector.load %arg6[%c4_69, %c2_70] : memref<22x22xf32, #tpu.memory_space<vmem>>, vector<16x16xf32>
    %191 = arith.index_cast %arg1 : i32 to index
    %c30 = arith.constant 30 : index
    %192 = memref.load %arg3[%191, %c30] : memref<4x49xf32, #tpu.memory_space<smem>>
    %193 = vector.broadcast %192 : f32 to vector<16x16xf32>
    %194 = arith.mulf %190, %193 : vector<16x16xf32>
    %195 = arith.addf %189, %194 : vector<16x16xf32>
    %c4_71 = arith.constant 4 : index
    %c3_72 = arith.constant 3 : index
    %196 = vector.load %arg6[%c4_71, %c3_72] : memref<22x22xf32, #tpu.memory_space<vmem>>, vector<16x16xf32>
    %197 = arith.index_cast %arg1 : i32 to index
    %c31 = arith.constant 31 : index
    %198 = memref.load %arg3[%197, %c31] : memref<4x49xf32, #tpu.memory_space<smem>>
    %199 = vector.broadcast %198 : f32 to vector<16x16xf32>
    %200 = arith.mulf %196, %199 : vector<16x16xf32>
    %201 = arith.addf %195, %200 : vector<16x16xf32>
    %c4_73 = arith.constant 4 : index
    %c4_74 = arith.constant 4 : index
    %202 = vector.load %arg6[%c4_73, %c4_74] : memref<22x22xf32, #tpu.memory_space<vmem>>, vector<16x16xf32>
    %203 = arith.index_cast %arg1 : i32 to index
    %c32 = arith.constant 32 : index
    %204 = memref.load %arg3[%203, %c32] : memref<4x49xf32, #tpu.memory_space<smem>>
    %205 = vector.broadcast %204 : f32 to vector<16x16xf32>
    %206 = arith.mulf %202, %205 : vector<16x16xf32>
    %207 = arith.addf %201, %206 : vector<16x16xf32>
    %c4_75 = arith.constant 4 : index
    %c5_76 = arith.constant 5 : index
    %208 = vector.load %arg6[%c4_75, %c5_76] : memref<22x22xf32, #tpu.memory_space<vmem>>, vector<16x16xf32>
    %209 = arith.index_cast %arg1 : i32 to index
    %c33 = arith.constant 33 : index
    %210 = memref.load %arg3[%209, %c33] : memref<4x49xf32, #tpu.memory_space<smem>>
    %211 = vector.broadcast %210 : f32 to vector<16x16xf32>
    %212 = arith.mulf %208, %211 : vector<16x16xf32>
    %213 = arith.addf %207, %212 : vector<16x16xf32>
    %c4_77 = arith.constant 4 : index
    %c6_78 = arith.constant 6 : index
    %214 = vector.load %arg6[%c4_77, %c6_78] : memref<22x22xf32, #tpu.memory_space<vmem>>, vector<16x16xf32>
    %215 = arith.index_cast %arg1 : i32 to index
    %c34 = arith.constant 34 : index
    %216 = memref.load %arg3[%215, %c34] : memref<4x49xf32, #tpu.memory_space<smem>>
    %217 = vector.broadcast %216 : f32 to vector<16x16xf32>
    %218 = arith.mulf %214, %217 : vector<16x16xf32>
    %219 = arith.addf %213, %218 : vector<16x16xf32>
    %c5_79 = arith.constant 5 : index
    %c0_80 = arith.constant 0 : index
    %220 = vector.load %arg6[%c5_79, %c0_80] : memref<22x22xf32, #tpu.memory_space<vmem>>, vector<16x16xf32>
    %221 = arith.index_cast %arg1 : i32 to index
    %c35 = arith.constant 35 : index
    %222 = memref.load %arg3[%221, %c35] : memref<4x49xf32, #tpu.memory_space<smem>>
    %223 = vector.broadcast %222 : f32 to vector<16x16xf32>
    %224 = arith.mulf %220, %223 : vector<16x16xf32>
    %225 = arith.addf %219, %224 : vector<16x16xf32>
    %c5_81 = arith.constant 5 : index
    %c1_82 = arith.constant 1 : index
    %226 = vector.load %arg6[%c5_81, %c1_82] : memref<22x22xf32, #tpu.memory_space<vmem>>, vector<16x16xf32>
    %227 = arith.index_cast %arg1 : i32 to index
    %c36 = arith.constant 36 : index
    %228 = memref.load %arg3[%227, %c36] : memref<4x49xf32, #tpu.memory_space<smem>>
    %229 = vector.broadcast %228 : f32 to vector<16x16xf32>
    %230 = arith.mulf %226, %229 : vector<16x16xf32>
    %231 = arith.addf %225, %230 : vector<16x16xf32>
    %c5_83 = arith.constant 5 : index
    %c2_84 = arith.constant 2 : index
    %232 = vector.load %arg6[%c5_83, %c2_84] : memref<22x22xf32, #tpu.memory_space<vmem>>, vector<16x16xf32>
    %233 = arith.index_cast %arg1 : i32 to index
    %c37 = arith.constant 37 : index
    %234 = memref.load %arg3[%233, %c37] : memref<4x49xf32, #tpu.memory_space<smem>>
    %235 = vector.broadcast %234 : f32 to vector<16x16xf32>
    %236 = arith.mulf %232, %235 : vector<16x16xf32>
    %237 = arith.addf %231, %236 : vector<16x16xf32>
    %c5_85 = arith.constant 5 : index
    %c3_86 = arith.constant 3 : index
    %238 = vector.load %arg6[%c5_85, %c3_86] : memref<22x22xf32, #tpu.memory_space<vmem>>, vector<16x16xf32>
    %239 = arith.index_cast %arg1 : i32 to index
    %c38 = arith.constant 38 : index
    %240 = memref.load %arg3[%239, %c38] : memref<4x49xf32, #tpu.memory_space<smem>>
    %241 = vector.broadcast %240 : f32 to vector<16x16xf32>
    %242 = arith.mulf %238, %241 : vector<16x16xf32>
    %243 = arith.addf %237, %242 : vector<16x16xf32>
    %c5_87 = arith.constant 5 : index
    %c4_88 = arith.constant 4 : index
    %244 = vector.load %arg6[%c5_87, %c4_88] : memref<22x22xf32, #tpu.memory_space<vmem>>, vector<16x16xf32>
    %245 = arith.index_cast %arg1 : i32 to index
    %c39 = arith.constant 39 : index
    %246 = memref.load %arg3[%245, %c39] : memref<4x49xf32, #tpu.memory_space<smem>>
    %247 = vector.broadcast %246 : f32 to vector<16x16xf32>
    %248 = arith.mulf %244, %247 : vector<16x16xf32>
    %249 = arith.addf %243, %248 : vector<16x16xf32>
    %c5_89 = arith.constant 5 : index
    %c5_90 = arith.constant 5 : index
    %250 = vector.load %arg6[%c5_89, %c5_90] : memref<22x22xf32, #tpu.memory_space<vmem>>, vector<16x16xf32>
    %251 = arith.index_cast %arg1 : i32 to index
    %c40 = arith.constant 40 : index
    %252 = memref.load %arg3[%251, %c40] : memref<4x49xf32, #tpu.memory_space<smem>>
    %253 = vector.broadcast %252 : f32 to vector<16x16xf32>
    %254 = arith.mulf %250, %253 : vector<16x16xf32>
    %255 = arith.addf %249, %254 : vector<16x16xf32>
    %c5_91 = arith.constant 5 : index
    %c6_92 = arith.constant 6 : index
    %256 = vector.load %arg6[%c5_91, %c6_92] : memref<22x22xf32, #tpu.memory_space<vmem>>, vector<16x16xf32>
    %257 = arith.index_cast %arg1 : i32 to index
    %c41 = arith.constant 41 : index
    %258 = memref.load %arg3[%257, %c41] : memref<4x49xf32, #tpu.memory_space<smem>>
    %259 = vector.broadcast %258 : f32 to vector<16x16xf32>
    %260 = arith.mulf %256, %259 : vector<16x16xf32>
    %261 = arith.addf %255, %260 : vector<16x16xf32>
    %c6_93 = arith.constant 6 : index
    %c0_94 = arith.constant 0 : index
    %262 = vector.load %arg6[%c6_93, %c0_94] : memref<22x22xf32, #tpu.memory_space<vmem>>, vector<16x16xf32>
    %263 = arith.index_cast %arg1 : i32 to index
    %c42 = arith.constant 42 : index
    %264 = memref.load %arg3[%263, %c42] : memref<4x49xf32, #tpu.memory_space<smem>>
    %265 = vector.broadcast %264 : f32 to vector<16x16xf32>
    %266 = arith.mulf %262, %265 : vector<16x16xf32>
    %267 = arith.addf %261, %266 : vector<16x16xf32>
    %c6_95 = arith.constant 6 : index
    %c1_96 = arith.constant 1 : index
    %268 = vector.load %arg6[%c6_95, %c1_96] : memref<22x22xf32, #tpu.memory_space<vmem>>, vector<16x16xf32>
    %269 = arith.index_cast %arg1 : i32 to index
    %c43 = arith.constant 43 : index
    %270 = memref.load %arg3[%269, %c43] : memref<4x49xf32, #tpu.memory_space<smem>>
    %271 = vector.broadcast %270 : f32 to vector<16x16xf32>
    %272 = arith.mulf %268, %271 : vector<16x16xf32>
    %273 = arith.addf %267, %272 : vector<16x16xf32>
    %c6_97 = arith.constant 6 : index
    %c2_98 = arith.constant 2 : index
    %274 = vector.load %arg6[%c6_97, %c2_98] : memref<22x22xf32, #tpu.memory_space<vmem>>, vector<16x16xf32>
    %275 = arith.index_cast %arg1 : i32 to index
    %c44 = arith.constant 44 : index
    %276 = memref.load %arg3[%275, %c44] : memref<4x49xf32, #tpu.memory_space<smem>>
    %277 = vector.broadcast %276 : f32 to vector<16x16xf32>
    %278 = arith.mulf %274, %277 : vector<16x16xf32>
    %279 = arith.addf %273, %278 : vector<16x16xf32>
    %c6_99 = arith.constant 6 : index
    %c3_100 = arith.constant 3 : index
    %280 = vector.load %arg6[%c6_99, %c3_100] : memref<22x22xf32, #tpu.memory_space<vmem>>, vector<16x16xf32>
    %281 = arith.index_cast %arg1 : i32 to index
    %c45 = arith.constant 45 : index
    %282 = memref.load %arg3[%281, %c45] : memref<4x49xf32, #tpu.memory_space<smem>>
    %283 = vector.broadcast %282 : f32 to vector<16x16xf32>
    %284 = arith.mulf %280, %283 : vector<16x16xf32>
    %285 = arith.addf %279, %284 : vector<16x16xf32>
    %c6_101 = arith.constant 6 : index
    %c4_102 = arith.constant 4 : index
    %286 = vector.load %arg6[%c6_101, %c4_102] : memref<22x22xf32, #tpu.memory_space<vmem>>, vector<16x16xf32>
    %287 = arith.index_cast %arg1 : i32 to index
    %c46 = arith.constant 46 : index
    %288 = memref.load %arg3[%287, %c46] : memref<4x49xf32, #tpu.memory_space<smem>>
    %289 = vector.broadcast %288 : f32 to vector<16x16xf32>
    %290 = arith.mulf %286, %289 : vector<16x16xf32>
    %291 = arith.addf %285, %290 : vector<16x16xf32>
    %c6_103 = arith.constant 6 : index
    %c5_104 = arith.constant 5 : index
    %292 = vector.load %arg6[%c6_103, %c5_104] : memref<22x22xf32, #tpu.memory_space<vmem>>, vector<16x16xf32>
    %293 = arith.index_cast %arg1 : i32 to index
    %c47 = arith.constant 47 : index
    %294 = memref.load %arg3[%293, %c47] : memref<4x49xf32, #tpu.memory_space<smem>>
    %295 = vector.broadcast %294 : f32 to vector<16x16xf32>
    %296 = arith.mulf %292, %295 : vector<16x16xf32>
    %297 = arith.addf %291, %296 : vector<16x16xf32>
    %c6_105 = arith.constant 6 : index
    %c6_106 = arith.constant 6 : index
    %298 = vector.load %arg6[%c6_105, %c6_106] : memref<22x22xf32, #tpu.memory_space<vmem>>, vector<16x16xf32>
    %299 = arith.index_cast %arg1 : i32 to index
    %c48 = arith.constant 48 : index
    %300 = memref.load %arg3[%299, %c48] : memref<4x49xf32, #tpu.memory_space<smem>>
    %301 = vector.broadcast %300 : f32 to vector<16x16xf32>
    %302 = arith.mulf %298, %301 : vector<16x16xf32>
    %303 = arith.addf %297, %302 : vector<16x16xf32>
    %cst_107 = arith.constant 5.000000e-01 : f32
    %304 = vector.broadcast %cst_107 : f32 to vector<16x16xf32>
    %305 = arith.mulf %304, %303 : vector<16x16xf32>
    %306 = math.tanh %305 : vector<16x16xf32>
    %cst_108 = arith.constant 1.000000e+00 : f32
    %307 = vector.broadcast %cst_108 : f32 to vector<16x16xf32>
    %308 = arith.addf %306, %307 : vector<16x16xf32>
    %cst_109 = arith.constant 5.000000e-01 : f32
    %309 = vector.broadcast %cst_109 : f32 to vector<16x16xf32>
    %310 = arith.mulf %309, %308 : vector<16x16xf32>
    %311 = arith.mulf %1, %310 : vector<16x16xf32>
    %c0_110 = arith.constant 0 : index
    %c0_111 = arith.constant 0 : index
    %c0_112 = arith.constant 0 : index
    %c0_113 = arith.constant 0 : index
    %312 = vector.load %arg5[%c0_110, %c0_111, %c0_112, %c0_113] : memref<1x1x16x16xf32, #tpu.memory_space<vmem>>, vector<1x1x16x16xf32>
    %313 = vector.shape_cast %312 : vector<1x1x16x16xf32> to vector<16x16xf32>
    %314 = vector.shape_cast %311 : vector<16x16xf32> to vector<1x1x16x16xf32>
    tpu.vector_store %arg5[%c0_110, %c0_111, %c0_112, %c0_113], %314 {strides = array<i32>} : memref<1x1x16x16xf32, #tpu.memory_space<vmem>>, vector<1x1x16x16xf32>,
    return
  }
  func.func @transform_0(%arg0: i32, %arg1: i32) -> (i32, i32, i32, i32) {
    %c0_i32 = arith.constant 0 : i32
    %c0_i32_0 = arith.constant 0 : i32
    %c0_i32_1 = arith.constant 0 : i32
    return %arg0, %arg1, %c0_i32, %c0_i32_0 : i32, i32, i32, i32
  }
  func.func @transform_1(%arg0: i32, %arg1: i32) -> (i32, i32) {
    %c0_i32 = arith.constant 0 : i32
    %c0_i32_0 = arith.constant 0 : i32
    %c0_i32_1 = arith.constant 0 : i32
    return %c0_i32, %c0_i32_0 : i32, i32
  }
  func.func @transform_2(%arg0: i32, %arg1: i32) -> i32 {
    %c0_i32 = arith.constant 0 : i32
    %c0_i32_0 = arith.constant 0 : i32
    return %c0_i32 : i32
  }
  func.func @transform_3(%arg0: i32, %arg1: i32) -> (i32, i32, i32, i32) {
    %c0_i32 = arith.constant 0 : i32
    %c0_i32_0 = arith.constant 0 : i32
    %c0_i32_1 = arith.constant 0 : i32
    return %arg0, %arg1, %c0_i32, %c0_i32_0 : i32, i32, i32, i32
  }
}

</mosaic_0001>

<bundles_post_ra>
// kernel: tpu_custom_call.1
= control target key start
LH: loop header
LB: loop body
LE: loop exit
PB: predicated region body
PF: predicated region fallthrough
CT: control target
= control target key end

     0   :  { %s2126_s0 = inlined_call_operand.hbm [shape: f32[2,4,16,16], index: 0, kind: input, shape index: {}]   ;;  %s2127_s1 = inlined_call_operand.hbm [shape: f32[4,49], index: 1, kind: input, shape index: {}]   ;;  %s2128_s2 = inlined_call_operand.vmem [shape: f32[4], index: 2, kind: input, shape index: {}]   ;;  %s2129_s3 = inlined_call_operand.hbm [shape: f32[2,4,16,16], index: 3, kind: output, shape index: {}]  }
   0x1   :  { %2146 = sst [smem:[#allocation18_spill]] %s2126_s0 }
   0x2   :  { %2147 = sst [smem:[#allocation19_spill]] %s2127_s1 }
   0x3   :  { %2148 = sst [smem:[#allocation20_spill]] %s2128_s2 }
   0x4   :  { %8 = vsyncpa [#allocation4], 0 }
   0x5   :  { %10 = vsyncpa [#allocation4 + $0x1], 0 }
   0x6   :  { %11 = vsyncpa [#allocation6], 0 }
   0x7   :  { %12 = vsyncpa [#allocation7], 0 }
   0x8   :  { %13 = vsyncpa [#allocation5], 0 }
   0x9   :  { %15 = vsyncpa [#allocation5 + $0x1], 0  ;;  %s1431_s12 = smov 0   ;;  %s1433_s13 = smov 0  }
   0xa   :  { %s1435_s14 = smov 0   ;;  %s1437_s15 = smov 0  }
   0xb   :  { %s1439_s16 = smov 0   ;;  %s1441_s17 = smov 0  }
   0xc   :  { %s1443_s18 = smov 0   ;;  %s1445_s19 = smov 0  }
   0xd LB: > { %2149 = sst [smem:[#allocation15_spill]] %s1385_s17  ;;  %s1090_s20 = sadd.s32 4294967295, %s1393_s19   ;;  %s1393_s19 = sphi %s1445_s19, %s21_s19   ;;  %s1389_s18 = sphi %s1443_s18, %s2179_s18   ;;  %s1385_s17 = sphi %s1441_s17, %s2173_s17   ;;  %s1381_s16 = sphi %s1439_s16, %s2178_s16   ;;  %s1377_s15 = sphi %s1437_s15, %s2172_s15   ;;  %s1373_s14 = sphi %s1435_s14, %s2177_s14   ;;  %s1369_s13 = sphi %s1433_s13, %s2176_s13   ;;  %s1365_s12 = sphi %s1431_s12, %s2175_s12  }
   0xe   : > { %s1091_s21 = sadd.s32 4294967294, %s1393_s19   ;;  %p49_p0 = scmp.ne.s32.totalorder %s1373_s14, %s1369_s13 }
   0xf   : > { %p50_p1 = scmp.eq.s32.totalorder %s1393_s19, 0  ;;  %p55_p2 = scmp.ne.s32.totalorder %s1369_s13, %s1365_s12 }
  0x10   : > { %p1479_p3 = scmp.eq.s32.totalorder %s1090_s20, 0  ;;  %p123_p4 = scmp.eq.s32.totalorder %s1090_s20, 7 }
  0x11   : > { %p51_p5 = por %p50_p1, %p49_p0  ;;  %p129_p6 = scmp.eq.s32.totalorder %s1091_s21, 7 }
  0x12   : > { %s2150_s23 = scalar_select %p1479_p3, 1, 0 }
  0x13   : > { %p1485_p7 = por %p1479_p3, %p55_p2  ;;  %p1489_p8 = por %p123_p4, %p49_p0 }
  0x14   : > { %p1493_p9 = por %p129_p6, %p55_p2  ;;  %p1092_p10 = scmp.ge.s32.totalorder %s1393_s19, 1 }
  0x15   : > { %s2151_s24 = scalar_select %p1485_p7, 1, 0 }
  0x16   : > { %s2152_s25 = scalar_select %p1489_p8, 1, 0 }
  0x17   : > { %s2153_s26 = scalar_select %p1493_p9, 1, 0 }
  0x18   : > { %p136_p11 = scmp.lt.s32.totalorder %s1393_s19, 9  ;;  %p1141_p13 = scmp.lt.s32.totalorder %s1393_s19, 8 }
  0x19   : > { %s2155_s2 = sld [smem:[#allocation20_spill]]  ;;  %s2158_s1 = sld [smem:[#allocation19_spill]] }
  0x1a   : > { %p1499_p12 = pnand %p1092_p10, %p136_p11  ;;  %p1509_p1 = pnand %p1141_p13, %p51_p5 }
  0x1c   : > { %p1124_p0 = pneg %p1499_p12 }
  0x1e   : > { %p1515_p2 = pnand %p1124_p0, %p1479_p3 }
  0x1f   : > { %s158_s30 = sshll.u32 %s2155_s2, 4  ;;  %s1229_s8 = scalar_lea.hbm %s2158_s1, 64  ;;  %s159_s30 = int_to_ptr.vmem [resolvable:$true] %s158_s30 }
  0x20   : > { %p1230_p4 = scmp.ne.s32.totalorder %s2158_s1, %s1229_s8  ;;  %p1231_p5 = pneg %p1515_p2 }
  0x21   : > { %p1236_p11 = scmp.lt.u32.totalorder %s1229_s8, %s2158_s1 }
  0x22   : > { %p1232_p6 = pnand %p1231_p5, %p1230_p4 }
  0x24   : > { %p1233_p10 = pneg %p1232_p6 }
  0x26   : > { %p1238_p13 = pnand %p1236_p11, %p1233_p10 }
  0x28   : > { %1241 = shalt.err (!%p1238_p13)
}
  0x29   : > { %s1395_s21 = smov [#allocation8]   ;;  %s1242_s6 = scalar_lea.vmem %s159_s30, 16 }
  0x2a   : > { %1127 = dma.hbm_to_smem (!%p1515_p2), %s2158_s1, 64, %s1395_s21, [#allocation6]  }
  0x2b   : > { %p1243_p0 = scmp.ne.s32.totalorder %s159_s30, %s1242_s6  ;;  %p1250_p3 = scmp.lt.s32.totalorder %s159_s30, %s159_s30 }
  0x2c   : > { %p1251_p4 = scmp.lt.s32.totalorder %s1242_s6, %s1242_s6 }
  0x2d   : > { %p1245_p9 = pnand %p1243_p0, %p1231_p5 }
  0x2e   : > { %p1252_p6 = por %p1251_p4, %p1250_p3 }
  0x2f   : > { %p1246_p8 = pneg %p1245_p9 }
  0x31   : > { %p1253_p7 = pnand %p1252_p6, %p1246_p8 }
  0x33   : > { %1256 = shalt.err (!%p1253_p7)
}
  0x34   : > { %s1396_s7 = smov [#allocation9]   ;;  %s30_s8 = sadd.s32 1, %s1385_s17 }
  0x35   : > { %1130 = dma.vmem_to_smem (!%p1515_p2), %s159_s30, 16, %s1396_s7, [#allocation7]  }
  0x36   : > { %s33_s9 = sadd.s32 1, %s1389_s18  ;;  %p31_p9 = scmp.ge.s32.totalorder %s30_s8, 4 }
  0x37   : > { %s169_s10 = sand.u32 1, %s1373_s14   ;;  %s1097_s20 = sshll.u32 %s1385_s17, 1 }
  0x38   : > { %s1096_s11 = sshll.u32 %s169_s10, 4  ;;  %s2181_s8 = smov (%p31_p9, %s30_s8), 0 }
  0x39   : > { %2159 = sst [smem:[#allocation16_spill]] %s2181_s8  ;;  %s2183_s9 = smov (!%p31_p9, %s33_s9), %s1389_s18 }
  0x3a   : > { %s38_s5 = ssub.s32 %s1385_s17, %s2181_s8  ;;  %p35_p3 = scmp.ge.s32.totalorder %s2183_s9, 2 }
  0x3b   : > { %s1098_s21 = sshll.u32 %s1389_s18, 3  ;;  %s173_s28 = scalar_lea.vmem [#allocation3], %s1096_s11 }
  0x3c   : > { %s182_s30 = sshll.u32 %s173_s28, 4  ;;  %s2185_s9 = smov (%p35_p3, %s2183_s9), 0  ;;  %s1549_s30 = int_to_ptr.vmem [resolvable:$true] %s182_s30 }
  0x3d   : > { %2160 = sst [smem:[#allocation17_spill]] %s2185_s9  ;;  %s179_s29 = sadd.s32 %s1098_s21, %s1097_s20 }
  0x3e   : > { %s37_s6 = ssub.s32 %s1389_s18, %s2185_s9  ;;  %s1099_s7 = sshll.u32 %s179_s29, 7 }
  0x3f   : > { %s39_s22 = sor.u32 %s38_s5, %s37_s6  ;;  %s2161_s0 = sld [smem:[#allocation18_spill]] }
  0x40   : > { %p40_p7 = scmp.eq.s32.totalorder %s39_s22, 0  ;;  %s2162_s11 = sadd.s32 1, %s1373_s14 }
  0x41   : > { %s1563_s17 = scalar_lea.sflag [#allocation4], %s169_s10  ;;  %p1259_p2 = pneg %p1509_p1 }
  0x42   : > { %s1561_s28 = scalar_select %p40_p7, %s1373_s14, %s2162_s11  }
  0x45   : > { %s1556_s8 = scalar_lea.hbm %s2161_s0, %s1099_s7  ;;  %s1262_s5 = scalar_lea.hbm %s2161_s0, 2048 }
  0x46   : > { %s1257_s20 = scalar_lea.hbm %s1556_s8, 256  ;;  %p1263_p11 = scmp.lt.u32.totalorder %s1556_s8, %s2161_s0 }
  0x47   : > { %p1258_p8 = scmp.ne.s32.totalorder %s1556_s8, %s1257_s20  ;;  %p1264_p13 = scmp.lt.u32.totalorder %s1262_s5, %s1257_s20 }
  0x48   : > { %p1266_p4 = scmp.lt.u32.totalorder %s1257_s20, %s1556_s8 }
  0x49   : > { %p1260_p5 = pnand %p1259_p2, %p1258_p8  ;;  %p1265_p0 = por %p1264_p13, %p1263_p11 }
  0x4b   : > { %p1261_p10 = pneg %p1260_p5  ;;  %p1267_p6 = por %p1266_p4, %p1265_p0 }
  0x4d   : > { %p1268_p9 = pnand %p1267_p6, %p1261_p10 }
  0x4f   : > { %1271 = shalt.err (!%p1268_p9)
}
  0x50   : > { %s1272_s22 = scalar_lea.vmem %s1549_s30, 256  ;;  %s1397_s10 = smov [#allocation3]  }
  0x51   : > { %p1273_p3 = scmp.ne.s32.totalorder %s1549_s30, %s1272_s22  ;;  %s1277_s6 = sshll.u32 %s1397_s10, 4  ;;  %s1278_s6 = int_to_ptr.vmem [resolvable:$false] %s1277_s6 }
  0x52   : > { %s1279_s7 = scalar_lea.vmem %s1278_s6, 512  ;;  %p1280_p5 = scmp.lt.s32.totalorder %s1549_s30, %s1278_s6 }
  0x53   : > { %p1275_p7 = pnand %p1273_p3, %p1259_p2  ;;  %p1281_p11 = scmp.lt.s32.totalorder %s1279_s7, %s1272_s22 }
  0x55   : > { %p1276_p8 = pneg %p1275_p7  ;;  %p1282_p13 = por %p1281_p11, %p1280_p5 }
  0x57   : > { %p1283_p0 = pnand %p1282_p13, %p1276_p8 }
  0x59   : > { %1286 = shalt.err (!%p1283_p0)
}
  0x5a   : > { %s1398_s11 = smov 128   ;;  %s1399_s20 = smov 8  }
  0x5b   : > { %1134 = dma.hbm_to_vmem [thread:$0]  (!%p1509_p1), %s1556_s8, 256, %s1549_s30, %s1563_s17, %s1398_s11, %s1398_s11, %s1399_s20  }
  0x5c   : > { %194 = sbr.rel (%p1499_p12) target bundleno = 554 (0x22a), region = 32  ;;  %s1594_s1 = sand.u32 (!%p1499_p12), 1, %s1369_s13  }
  0x5d   : > { %s2136_s2 = sshll.u32 (!%p1499_p12), %s1594_s1, 4  ;;  %s197_s5 = scalar_lea.sflag (!%p1499_p12), [#allocation4], %s1594_s1 }
  0x5e   : > { %s1600_s21 = scalar_lea.vmem (!%p1499_p12), [#allocation3], %s2136_s2  ;;  %p2163_p2 = scmp.ne.s32.totalorder (!%p1499_p12), %s2151_s24, 0 }
  0x63   : > { %1348 = dma.done.wait (%p2163_p2), %s197_s5, 256  }
  0x64   : > { %1350 = vsyncadd (%p2163_p2), %s197_s5, 4294967040  ;;  %p2164_p1 = scmp.ne.s32.totalorder %s2150_s23, 0 }
  0x66   : > { %1352 = dma.done.wait (%p2164_p1), [#allocation6], 64  }
  0x67   : > { %1354 = vsyncadd (%p2164_p1), [#allocation6], 4294967232 }
  0x68   : > { %1356 = dma.done.wait (%p2164_p1), [#allocation7], 16  }
  0x69   : > { %1358 = vsyncadd (%p2164_p1), [#allocation7], 4294967280 }
  0x6a   : > { %213 = sfence }
  0x6b   : > { %v232_v0 = vld [vmem:[%s1600_s21] sm:$0xff]  ;;  %v233_v1 = vld [vmem:[%s1600_s21 + $0x8] sm:$0xff]  ;;  %vm234_vm0 = vcmask 179200   ;;  %v1400_v3 = vmov 0.0   ;;  %vm237_vm1 = vcmask 177152   ;;  %s1401_s17 = smov 3  }
  0x6c   : > { %v239_v2 = vmax.f32 %v232_v0, 0.0  ;;  %235 = vst.msk [vmem:[#allocation2] sm:$0xff] %vm234_vm0, %v1400_v3  ;;  %236 = vst.msk [vmem:[#allocation2 + $0x8] sm:$0xff] %vm234_vm0, %v1400_v3  ;;  %v240_v4 = vmax.f32 %v233_v1, 0.0  ;;  %s1617_s24 = sshll.u32 %s1377_s15, 7  ;;  %vm249_vm2 = vcmask 154648  }
  0x6d   : > { %238 = vst.msk [vmem:[#allocation2 + $0x10] sm:$0x3f] %vm237_vm1, %v1400_v3  ;;  %s278_s23 = sadd.s32 2, %s1617_s24  ;;  %s263_s27 = sadd.s32 1, %s1617_s24  ;;  %vm957_vm3 = vcmask 130048  }
  0x6e   : > { %243 = vrot.lane.b32.xlu0 %v239_v2, %s1401_s17  ;;  %s1621_s4 = sld [smem:[#allocation8 + %s278_s23]]  ;;  %s293_s30 = sadd.s32 3, %s1617_s24 }
  0x6f   : > { %s264_s8 = sld [smem:[#allocation8 + %s263_s27]]  ;;  %s308_s22 = sadd.s32 4, %s1617_s24 }
  0x70   : > { %s1624_s29 = sld [smem:[#allocation8 + %s293_s30]]  ;;  %s323_s6 = sadd.s32 5, %s1617_s24 }
  0x71   : > { %s1628_s10 = sld [smem:[#allocation8 + %s308_s22]]  ;;  %s2143_s11 = smov 126  }
  0x72   : > { %245 = vrot.lane.b32.xlu0 %v240_v4, %s1401_s17  ;;  %s1632_s7 = sld [smem:[#allocation8 + %s323_s6]]  ;;  %s2137_s20 = smov 127  }
  0x73   : > { %s338_s5 = sadd.s32 6, %s1617_s24  ;;  %s1641_s17 = sld [smem:[#allocation8 + %s1617_s24]] }
  0x74   : > { %v280_v7 = vstv %s1621_s4  ;;  %s355_s23 = sadd.s32 7, %s1617_s24  ;;  %s1645_s27 = sld [smem:[#allocation8 + %s338_s5]] }
  0x75   : > { %v265_v8 = vstv %s264_s8  ;;  %s362_s4 = sadd.s32 8, %s1617_s24  ;;  %s2139_s8 = smov 125  }
  0x76   : > { %v295_v12 = vstv %s1624_s29  ;;  %s1650_s30 = sld [smem:[#allocation8 + %s355_s23]]  ;;  %s454_s29 = sadd.s32 14, %s1617_s24 }
  0x77   : > { %v310_v16 = vstv %s1628_s10  ;;  %s1654_s22 = sld [smem:[#allocation8 + %s362_s4]]  ;;  %s377_s10 = sadd.s32 9, %s1617_s24 }
  0x78   : > { %v325_v19 = vstv %s1632_s7  ;;  %s392_s6 = sadd.s32 10, %s1617_s24  ;;  %s2141_s5 = smov 124  }
  0x79   : > { %s1661_s2 = sld [smem:[#allocation8 + %s454_s29]]  ;;  %s553_s23 = sadd.s32 21, %s1617_s24  ;;  %v258_v22 = vstv %s1641_s17 }
  0x7a   : > { %s850_s4 = sadd.s32 42, %s1617_s24  ;;  %v340_v23 = vstv %s1645_s27  ;;  %s1670_s7 = sld [smem:[#allocation8 + %s377_s10]] }
  0x7b   : > { %s1672_s0 = sld [smem:[#allocation8 + %s553_s23]]  ;;  %s2165_s29 = smov 125  }
  0x7c   : > { %s1682_s17 = sld [smem:[#allocation8 + %s392_s6]]  ;;  %v357_v26 = vstv %s1650_s30  ;;  %s407_s10 = sadd.s32 11, %s1617_s24 }
  0x7d   : > { %s1687_s27 = sld [smem:[#allocation8 + %s850_s4]]  ;;  %v364_v30 = vstv %s1654_s22  ;;  %s422_s22 = sadd.s32 12, %s1617_s24 }
  0x7e   : > { %s1713_s30 = sld [smem:[#allocation8 + %s407_s10]]  ;;  %s461_s23 = sadd.s32 15, %s1617_s24 }
  0x7f   : > { %v456_v34 = vstv %s1661_s2  ;;  %s2167_s2 = smov 127   ;;  %s1787_s4 = sld [smem:[#allocation8 + %s461_s23]] }
  0x80   : > { %v379_v39 = vstv %s1670_s7  ;;  %s476_s7 = sadd.s32 16, %s1617_s24  ;;  %p2170_p10 = scmp.ne.s32.totalorder %s2152_s25, 0 }
  0x81   : > { %v555_v43 = vstv %s1672_s0  ;;  %s1753_s0 = sld [smem:[#allocation8 + %s422_s22]] }
  0x82   : > { %v394_v50 = vstv %s1682_s17  ;;  %s1795_s17 = sld [smem:[#allocation8 + %s476_s7]] }
  0x83   : > { %v852_v54 = vstv %s1687_s27  ;;  %s491_s27 = sadd.s32 17, %s1617_s24 }
  0x84   : > { %v409_v3 = vstv %s1713_s30  ;;  %s1803_s10 = sld [smem:[#allocation8 + %s491_s27]]  ;;  %s506_s30 = sadd.s32 18, %s1617_s24 }
  0x85   : > { %s1811_s22 = sld [smem:[#allocation8 + %s506_s30]] }
  0xe0   : > { %v244_v5 = vpop.permute.xlu0 %243 }
  0xe1   : > { %250 = vst.msk [vmem:[#allocation2 + $0x3] sm:$0xff] %vm249_vm2, %v244_v5 }
  0xe4   : > { %v246_v6 = vpop.permute.xlu0 %245 }
  0xe5   : > { %251 = vst.msk [vmem:[#allocation2 + $0xb] sm:$0xff] %vm249_vm2, %v246_v6  ;;  %v424_v6 = vstv %s1753_s0  ;;  %s521_s0 = sadd.s32 19, %s1617_s24 }
  0xe8   : > { %v254_v9 = vld [vmem:[#allocation2] sm:$0xff] }
  0xe9   : > { %v281_v10 = vmul.f32 %v280_v7, %v254_v9  ;;  %v266_v11 = vmul.f32 %v265_v8, %v254_v9  ;;  %v296_v15 = vmul.f32 %v295_v12, %v254_v9  ;;  %v311_v17 = vmul.f32 %v310_v16, %v254_v9  ;;  %v1680_v24 = vld [vmem:[#allocation2 + $0x1] sm:$0xff] }
  0xea   : > { %v326_v20 = vmul.f32 %v325_v19, %v254_v9  ;;  %v1684_v25 = vmul.f32 %v258_v22, %v254_v9  ;;  %v341_v27 = vmul.f32 %v340_v23, %v254_v9  ;;  %v1700_v32 = vmul.f32 %v357_v26, %v1680_v24  ;;  %v1702_v33 = vld [vmem:[#allocation2 + $0x2] sm:$0xff] }
  0xeb   : > { %285 = vrot.lane.b32.xlu0 %v281_v10, %s2143_s11  ;;  %270 = vrot.lane.b32.xlu1 %v266_v11, %s2137_s20  ;;  %v365_v35 = vmul.f32 %v364_v30, %v1680_v24  ;;  %v1715_v40 = vld [vmem:[#allocation2 + $0x3] sm:$0xff]  ;;  %v1732_v47 = vmul.f32 %v456_v34, %v1702_v33  ;;  %v380_v55 = vmul.f32 %v379_v39, %v1680_v24 }
  0xec   : > { %v1637_v13 = vld [vmem:[#allocation2 + $0x8] sm:$0xff]  ;;  %v1748_v57 = vmul.f32 %v555_v43, %v1715_v40  ;;  %v395_v1 = vmul.f32 %v394_v50, %v1680_v24  ;;  %v410_v4 = vmul.f32 %v409_v3, %v1680_v24 }
  0xed   : > { %v267_v14 = vmul.f32 %v265_v8, %v1637_v13  ;;  %v282_v18 = vmul.f32 %v280_v7, %v1637_v13  ;;  %v297_v21 = vmul.f32 %v295_v12, %v1637_v13  ;;  %v312_v28 = vmul.f32 %v310_v16, %v1637_v13  ;;  %v1694_v31 = vld [vmem:[#allocation2 + $0x9] sm:$0xff] }
  0xee   : > { %v1691_v29 = vmul.f32 %v258_v22, %v1637_v13  ;;  %v327_v36 = vmul.f32 %v325_v19, %v1637_v13  ;;  %v1707_v37 = vld [vmem:[#allocation2 + $0xa] sm:$0xff]  ;;  %v1710_v38 = vmul.f32 %v357_v26, %v1694_v31  ;;  %v342_v56 = vmul.f32 %v340_v23, %v1637_v13 }
  0xef   : > { %300 = vrot.lane.b32.xlu0 %v296_v15, %s2139_s8  ;;  %272 = vrot.lane.b32.xlu1 %v267_v14, %s2137_s20  ;;  %s652_s20 = sadd.s32 28, %s1617_s24  ;;  %s751_s8 = sadd.s32 35, %s1617_s24  ;;  %v1717_v41 = vld [vmem:[#allocation2 + $0xb] sm:$0xff]  ;;  %v1742_v53 = vmul.f32 %v456_v34, %v1707_v37  ;;  %v366_v2 = vmul.f32 %v364_v30, %v1694_v31  ;;  %v381_v5 = vmul.f32 %v379_v39, %v1694_v31  ;;  %v463_v12 = vstv %s1787_s4 }
  0xf0   : > { %s1678_s9 = sld [smem:[#allocation8 + %s751_s8]]  ;;  %s2166_s8 = smov 124   ;;  %v1719_v42 = vld [vmem:[#allocation2 + $0x4] sm:$0xff]  ;;  %v1725_v44 = vld [vmem:[#allocation2 + $0xc] sm:$0xff]  ;;  %v1751_v58 = vmul.f32 %v555_v43, %v1717_v41  ;;  %v425_v7 = vmul.f32 %v424_v6, %v1680_v24  ;;  %v396_v8 = vmul.f32 %v394_v50, %v1694_v31  ;;  %v411_v11 = vmul.f32 %v409_v3, %v1694_v31 }
  0xf1   : > { %v1727_v45 = vld [vmem:[#allocation2 + $0x5] sm:$0xff]  ;;  %v1729_v46 = vld [vmem:[#allocation2 + $0xd] sm:$0xff]  ;;  %v464_v13 = vmul.f32 %v463_v12, %v1702_v33  ;;  %v426_v14 = vmul.f32 %v424_v6, %v1694_v31  ;;  %v478_v15 = vstv %s1795_s17  ;;  %s560_s4 = sadd.s32 22, %s1617_s24  ;;  %s575_s17 = sadd.s32 23, %s1617_s24 }
  0xf2   : > { %v1737_v51 = vld [vmem:[#allocation2 + $0x6] sm:$0xff]  ;;  %v1739_v52 = vld [vmem:[#allocation2 + $0xe] sm:$0xff]  ;;  %v479_v16 = vmul.f32 %v478_v15, %v1702_v33  ;;  %v480_v23 = vmul.f32 %v478_v15, %v1707_v37  ;;  %s1835_s7 = sld [smem:[#allocation8 + %s560_s4]] }
  0xf3   : > { %315 = vrot.lane.b32.xlu0 %v311_v17, %s2141_s5  ;;  %287 = vrot.lane.b32.xlu1 %v282_v18, %s2143_s11  ;;  %s1406_s5 = smov 123   ;;  %s1676_s11 = sld [smem:[#allocation8 + %s652_s20]]  ;;  %v1771_v63 = vmul.f32 %v852_v54, %v1737_v51  ;;  %v1774_v0 = vmul.f32 %v852_v54, %v1739_v52  ;;  %v493_v18 = vstv %s1803_s10 }
  0xf4   : > { %s1407_s20 = smov 122   ;;  %v494_v19 = vmul.f32 %v493_v18, %v1702_v33  ;;  %s1843_s27 = sld [smem:[#allocation8 + %s575_s17]] }
  0xf5   : > { %s590_s10 = sadd.s32 24, %s1617_s24 }
  0xf6   : > { %v753_v49 = vstv %s1678_s9  ;;  %s2168_s9 = smov 126   ;;  %s1851_s30 = sld [smem:[#allocation8 + %s590_s10]] }
  0xf7   : > { %330 = vrot.lane.b32.xlu0 %v326_v20, %s1406_s5  ;;  %302 = vrot.lane.b32.xlu1 %v297_v21, %s2165_s29  ;;  %v1762_v61 = vmul.f32 %v753_v49, %v1727_v45  ;;  %v1765_v62 = vmul.f32 %v753_v49, %v1729_v46  ;;  %v465_v20 = vmul.f32 %v463_v12, %v1707_v37  ;;  %v508_v21 = vstv %s1811_s22  ;;  %s605_s22 = sadd.s32 25, %s1617_s24 }
  0xf8   : > { %v509_v22 = vmul.f32 %v508_v21, %v1702_v33  ;;  %v562_v34 = vstv %s1835_s7  ;;  %s659_s7 = sadd.s32 29, %s1617_s24 }
  0xf9   : > { %v654_v48 = vstv %s1676_s11  ;;  %s437_s11 = sadd.s32 13, %s1617_s24  ;;  %v564_v50 = vmul.f32 %v562_v34, %v1717_v41  ;;  %s1883_s17 = sld [smem:[#allocation8 + %s659_s7]] }
  0xfa   : > { %v1756_v59 = vmul.f32 %v654_v48, %v1719_v42  ;;  %v1759_v60 = vmul.f32 %v654_v48, %v1725_v44  ;;  %s1779_s6 = sld [smem:[#allocation8 + %s437_s11]]  ;;  %v577_v39 = vstv %s1843_s27  ;;  %s674_s27 = sadd.s32 30, %s1617_s24 }
  0xfb   : > { %345 = vrot.lane.b32.xlu0 %v341_v27, %s1407_s20  ;;  %317 = vrot.lane.b32.xlu1 %v312_v28, %s2166_s8  ;;  %s1819_s11 = sld [smem:[#allocation8 + %s521_s0]]  ;;  %v495_v27 = vmul.f32 %v493_v18, %v1707_v37 }
  0xfc   : > { %s1859_s0 = sld [smem:[#allocation8 + %s605_s22]]  ;;  %v592_v48 = vstv %s1851_s30  ;;  %s689_s30 = sadd.s32 31, %s1617_s24 }
  0xfd   : > { %v593_v49 = vmul.f32 %v592_v48, %v1715_v40  ;;  %s1891_s10 = sld [smem:[#allocation8 + %s674_s27]] }
  0xfe   : > { %s1899_s22 = sld [smem:[#allocation8 + %s689_s30]]  ;;  %s773_s30 = sadd.s32 37, %s1617_s24 }
  0xff   : > { %369 = vrot.lane.b32.xlu0 %v365_v35, %s2167_s2  ;;  %332 = vrot.lane.b32.xlu1 %v327_v36, %s1406_s5  ;;  %v563_v35 = vmul.f32 %v562_v34, %v1715_v40  ;;  %v661_v6 = vstv %s1883_s17  ;;  %s758_s17 = sadd.s32 36, %s1617_s24  ;;  %s1931_s27 = sld [smem:[#allocation9 + %s1377_s15]] }
 0x100   : > { %v439_v9 = vstv %s1779_s6  ;;  %s536_s6 = sadd.s32 20, %s1617_s24 }
 0x101   : > { %v440_v10 = vmul.f32 %v439_v9, %v1680_v24  ;;  %v441_v17 = vmul.f32 %v439_v9, %v1694_v31  ;;  %s1827_s23 = sld [smem:[#allocation8 + %s536_s6]]  ;;  %v523_v24 = vstv %s1819_s11  ;;  %v510_v31 = vmul.f32 %v508_v21, %v1707_v37  ;;  %s620_s11 = sadd.s32 26, %s1617_s24 }
 0x102   : > { %v524_v26 = vmul.f32 %v523_v24, %v1702_v33  ;;  %v525_v36 = vmul.f32 %v523_v24, %v1707_v37  ;;  %s1867_s6 = sld [smem:[#allocation8 + %s620_s11]]  ;;  %v607_v54 = vstv %s1859_s0  ;;  %s704_s0 = sadd.s32 32, %s1617_s24 }
 0x103   : > { %384 = vrot.lane.b32.xlu0 %v380_v55, %s2168_s9  ;;  %347 = vrot.lane.b32.xlu1 %v342_v56, %s1407_s20  ;;  %v579_v55 = vmul.f32 %v577_v39, %v1717_v41  ;;  %v676_v9 = vstv %s1891_s10  ;;  %s1907_s11 = sld [smem:[#allocation8 + %s704_s0]]  ;;  %s788_s0 = sadd.s32 38, %s1617_s24 }
 0x104   : > { %v678_v15 = vmul.f32 %v676_v9, %v1725_v44  ;;  %s1934_s10 = sld [smem:[#allocation8 + %s758_s17]]  ;;  %s833_s17 = sadd.s32 41, %s1617_s24 }
 0x107   : > { %399 = vrot.lane.b32.xlu0 %v395_v1, %s2165_s29  ;;  %371 = vrot.lane.b32.xlu1 %v366_v2, %s2167_s2  ;;  %v538_v28 = vstv %s1827_s23  ;;  %s635_s23 = sadd.s32 27, %s1617_s24  ;;  %v594_v2 = vmul.f32 %v592_v48, %v1717_v41 }
 0x108   : > { %v539_v30 = vmul.f32 %v538_v28, %v1702_v33  ;;  %v578_v33 = vmul.f32 %v577_v39, %v1715_v40  ;;  %v540_v43 = vmul.f32 %v538_v28, %v1707_v37  ;;  %s1875_s4 = sld [smem:[#allocation8 + %s635_s23]]  ;;  %v608_v37 = vmul.f32 %v607_v54, %v1715_v40 }
 0x109   : > { %v622_v56 = vstv %s1867_s6  ;;  %s719_s6 = sadd.s32 33, %s1617_s24 }
 0x10a   : > { %v623_v1 = vmul.f32 %v622_v56, %v1715_v40  ;;  %s1915_s23 = sld [smem:[#allocation8 + %s719_s6]]  ;;  %s803_s6 = sadd.s32 39, %s1617_s24 }
 0x10b   : > { %414 = vrot.lane.b32.xlu0 %v410_v4, %s2166_s8  ;;  %386 = vrot.lane.b32.xlu1 %v381_v5, %s2168_s9  ;;  %v609_v5 = vmul.f32 %v607_v54, %v1717_v41 }
 0x10e   : > { %v637_v3 = vstv %s1875_s4  ;;  %s734_s4 = sadd.s32 34, %s1617_s24 }
 0x10f   : > { %429 = vrot.lane.b32.xlu0 %v425_v7, %s1406_s5  ;;  %401 = vrot.lane.b32.xlu1 %v396_v8, %s2165_s29  ;;  %v638_v4 = vmul.f32 %v637_v3, %v1715_v40  ;;  %v662_v7 = vmul.f32 %v661_v6, %v1719_v42  ;;  %v624_v8 = vmul.f32 %v622_v56, %v1717_v41  ;;  %s1923_s7 = sld [smem:[#allocation8 + %s734_s4]]  ;;  %s818_s4 = sadd.s32 40, %s1617_s24 }
 0x110   : > { %v677_v40 = vmul.f32 %v676_v9, %v1719_v42 }
 0x113   : > { %444 = vrot.lane.b32.xlu0 %v440_v10, %s1407_s20  ;;  %416 = vrot.lane.b32.xlu1 %v411_v11, %s2166_s8  ;;  %v639_v10 = vmul.f32 %v637_v3, %v1717_v41  ;;  %v691_v11 = vstv %s1899_s22  ;;  %s1942_s22 = sld [smem:[#allocation8 + %s773_s30]] }
 0x114   : > { %v692_v12 = vmul.f32 %v691_v11, %v1719_v42  ;;  %v693_v18 = vmul.f32 %v691_v11, %v1725_v44 }
 0x117   : > { %468 = vrot.lane.b32.xlu0 %v464_v13, %s2167_s2  ;;  %431 = vrot.lane.b32.xlu1 %v426_v14, %s1406_s5  ;;  %v663_v13 = vmul.f32 %v661_v6, %v1725_v44  ;;  %v706_v14 = vstv %s1907_s11  ;;  %s1951_s11 = sld [smem:[#allocation8 + %s788_s0]] }
 0x118   : > { %v707_v41 = vmul.f32 %v706_v14, %v1719_v42  ;;  %v708_v21 = vmul.f32 %v706_v14, %v1725_v44 }
 0x11b   : > { %483 = vrot.lane.b32.xlu0 %v479_v16, %s2168_s9  ;;  %446 = vrot.lane.b32.xlu1 %v441_v17, %s1407_s20  ;;  %v721_v16 = vstv %s1915_s23  ;;  %s1960_s23 = sld [smem:[#allocation8 + %s803_s6]] }
 0x11c   : > { %v722_v17 = vmul.f32 %v721_v16, %v1719_v42 }
 0x11f   : > { %498 = vrot.lane.b32.xlu0 %v494_v19, %s2165_s29  ;;  %470 = vrot.lane.b32.xlu1 %v465_v20, %s2167_s2  ;;  %v736_v19 = vstv %s1923_s7  ;;  %s1969_s7 = sld [smem:[#allocation8 + %s818_s4]] }
 0x120   : > { %v737_v20 = vmul.f32 %v736_v19, %v1719_v42  ;;  %v723_v42 = vmul.f32 %v721_v16, %v1725_v44 }
 0x121   : > { %v805_v56 = vstv %s1960_s23  ;;  %s902_s23 = sadd.s32 46, %s1617_s24 }
 0x122   : > { %v806_v3 = vmul.f32 %v805_v56, %v1727_v45  ;;  %s2010_s4 = sld [smem:[#allocation8 + %s902_s23]] }
 0x123   : > { %513 = vrot.lane.b32.xlu0 %v509_v22, %s2166_s8  ;;  %485 = vrot.lane.b32.xlu1 %v480_v23, %s2168_s9  ;;  %v253_v22 = vstv %s1931_s27  ;;  %v760_v23 = vstv %s1934_s10  ;;  %s1977_s27 = sld [smem:[#allocation8 + %s833_s17]]  ;;  %s857_s10 = sadd.s32 43, %s1617_s24 }
 0x124   : > { %v261_v24 = vadd.f32 %v1684_v25, %v253_v22  ;;  %v761_v28 = vmul.f32 %v760_v23, %v1727_v45  ;;  %v262_v25 = vadd.f32 %v1691_v29, %v253_v22  ;;  %s1985_s30 = sld [smem:[#allocation8 + %s857_s10]] }
 0x125   : > { %v820_v6 = vstv %s1969_s7  ;;  %s917_s7 = sadd.s32 47, %s1617_s24 }
 0x126   : > { %v822_v22 = vmul.f32 %v820_v6, %v1729_v46  ;;  %s2019_s17 = sld [smem:[#allocation8 + %s917_s7]] }
 0x127   : > { %528 = vrot.lane.b32.xlu0 %v524_v26, %s1406_s5  ;;  %500 = vrot.lane.b32.xlu1 %v495_v27, %s2165_s29 }
 0x12b   : > { %543 = vrot.lane.b32.xlu0 %v539_v30, %s1407_s20  ;;  %515 = vrot.lane.b32.xlu1 %v510_v31, %s2166_s8  ;;  %v775_v31 = vstv %s1942_s22  ;;  %s872_s22 = sadd.s32 44, %s1617_s24 }
 0x12c   : > { %v776_v39 = vmul.f32 %v775_v31, %v1727_v45  ;;  %s1993_s0 = sld [smem:[#allocation8 + %s872_s22]]  ;;  %s961_s22 = scalar_lea.sflag [#allocation5], %s1594_s1 }
 0x12f   : > { %567 = vrot.lane.b32.xlu0 %v563_v35, %s2167_s2  ;;  %530 = vrot.lane.b32.xlu1 %v525_v36, %s1406_s5 }
 0x133   : > { %582 = vrot.lane.b32.xlu0 %v578_v33, %s2168_s9  ;;  %545 = vrot.lane.b32.xlu1 %v540_v43, %s1407_s20  ;;  %v738_v33 = vmul.f32 %v736_v19, %v1725_v44 }
 0x137   : > { %597 = vrot.lane.b32.xlu0 %v593_v49, %s2165_s29  ;;  %569 = vrot.lane.b32.xlu1 %v564_v50, %s2167_s2  ;;  %v790_v49 = vstv %s1951_s11  ;;  %s887_s11 = sadd.s32 45, %s1617_s24 }
 0x138   : > { %v791_v54 = vmul.f32 %v790_v49, %v1727_v45  ;;  %s2002_s6 = sld [smem:[#allocation8 + %s887_s11]]  ;;  %s1408_s11 = smov [#allocation10]  }
 0x13b   : > { %612 = vrot.lane.b32.xlu0 %v608_v37, %s2166_s8  ;;  %584 = vrot.lane.b32.xlu1 %v579_v55, %s2168_s9  ;;  %v762_v37 = vmul.f32 %v760_v23, %v1729_v46  ;;  %v874_v23 = vstv %s1993_s0 }
 0x13f   : > { %627 = vrot.lane.b32.xlu0 %v623_v1, %s1406_s5  ;;  %599 = vrot.lane.b32.xlu1 %v594_v2, %s2165_s29 }
 0x143   : > { %642 = vrot.lane.b32.xlu0 %v638_v4, %s1407_s20  ;;  %614 = vrot.lane.b32.xlu1 %v609_v5, %s2166_s8  ;;  %v777_v4 = vmul.f32 %v775_v31, %v1729_v46 }
 0x147   : > { %666 = vrot.lane.b32.xlu0 %v662_v7, %s2167_s2  ;;  %629 = vrot.lane.b32.xlu1 %v624_v8, %s1406_s5 }
 0x14b   : > { %681 = vrot.lane.b32.xlu0 %v677_v40, %s2168_s9  ;;  %644 = vrot.lane.b32.xlu1 %v639_v10, %s1407_s20  ;;  %v821_v40 = vmul.f32 %v820_v6, %v1727_v45  ;;  %v792_v10 = vmul.f32 %v790_v49, %v1729_v46  ;;  %v876_v49 = vmul.f32 %v874_v23, %v1739_v52 }
 0x14f   : > { %696 = vrot.lane.b32.xlu0 %v692_v12, %s2165_s29  ;;  %668 = vrot.lane.b32.xlu1 %v663_v13, %s2167_s2  ;;  %v835_v13 = vstv %s1977_s27  ;;  %s932_s27 = sadd.s32 48, %s1617_s24  ;;  %s1107_s24 = sshll.u32 %s1377_s15, 1 }
 0x150   : > { %v836_v16 = vmul.f32 %v835_v13, %v1727_v45  ;;  %s2027_s10 = sld [smem:[#allocation8 + %s932_s27]] }
 0x153   : > { %711 = vrot.lane.b32.xlu0 %v707_v41, %s2166_s8  ;;  %683 = vrot.lane.b32.xlu1 %v678_v15, %s2168_s9 }
 0x157   : > { %726 = vrot.lane.b32.xlu0 %v722_v17, %s1406_s5  ;;  %698 = vrot.lane.b32.xlu1 %v693_v18, %s2165_s29  ;;  %v807_v17 = vmul.f32 %v805_v56, %v1729_v46  ;;  %v859_v18 = vstv %s1985_s30 }
 0x15b   : > { %741 = vrot.lane.b32.xlu0 %v737_v20, %s1407_s20  ;;  %713 = vrot.lane.b32.xlu1 %v708_v21, %s2166_s8  ;;  %v860_v21 = vmul.f32 %v859_v18, %v1737_v51 }
 0x15d   : > { %v271_v26 = vpop.permute.xlu1 %270  ;;  %v286_v27 = vpop.permute.xlu0 %285 }
 0x15e   : > { %v276_v30 = vadd.f32 %v271_v26, %v261_v24 }
 0x15f   : > { %765 = vrot.lane.b32.xlu0 %v761_v28, %s2167_s2  ;;  %728 = vrot.lane.b32.xlu1 %v723_v42, %s1406_s5  ;;  %v875_v28 = vmul.f32 %v874_v23, %v1737_v51  ;;  %v837_v42 = vmul.f32 %v835_v13, %v1729_v46 }
 0x160   : > { %v291_v34 = vadd.f32 %v286_v27, %v276_v30  ;;  %v889_v30 = vstv %s2002_s6  ;;  %s1291_s6 = sshll.u32 %s1408_s11, 4  ;;  %s1292_s6 = int_to_ptr.vmem [resolvable:$false] %s1291_s6 }
 0x161   : > { %v273_v35 = vpop.permute.xlu1 %272  ;;  %v301_v36 = vpop.permute.xlu0 %300  ;;  %s1293_s23 = scalar_lea.vmem %s1292_s6, 512 }
 0x162   : > { %v277_v43 = vadd.f32 %v273_v35, %v262_v25  ;;  %v306_v48 = vadd.f32 %v301_v36, %v291_v34  ;;  %v861_v35 = vmul.f32 %v859_v18, %v1739_v52 }
 0x163   : > { %780 = vrot.lane.b32.xlu0 %v776_v39, %s2168_s9  ;;  %743 = vrot.lane.b32.xlu1 %v738_v33, %s1407_s20  ;;  %v904_v39 = vstv %s2010_s4 }
 0x165   : > { %v288_v50 = vpop.permute.xlu1 %287  ;;  %v316_v29 = vpop.permute.xlu0 %315 }
 0x166   : > { %v292_v55 = vadd.f32 %v288_v50, %v277_v43  ;;  %v321_v44 = vadd.f32 %v316_v29, %v306_v48  ;;  %v905_v48 = vmul.f32 %v904_v39, %v1737_v51  ;;  %v919_v29 = vstv %s2019_s17 }
 0x167   : > { %795 = vrot.lane.b32.xlu0 %v791_v54, %s2165_s29  ;;  %767 = vrot.lane.b32.xlu1 %v762_v37, %s2167_s2  ;;  %v920_v56 = vmul.f32 %v919_v29, %v1737_v51 }
 0x169   : > { %v303_v1 = vpop.permute.xlu1 %302  ;;  %v331_v2 = vpop.permute.xlu0 %330 }
 0x16a   : > { %v307_v5 = vadd.f32 %v303_v1, %v292_v55  ;;  %v336_v7 = vadd.f32 %v331_v2, %v321_v44  ;;  %v891_v1 = vmul.f32 %v889_v30, %v1739_v52 }
 0x16b   : > { %810 = vrot.lane.b32.xlu0 %v806_v3, %s2166_s8  ;;  %782 = vrot.lane.b32.xlu1 %v777_v4, %s2168_s9  ;;  %v934_v4 = vstv %s2027_s10 }
 0x16d   : > { %v318_v8 = vpop.permute.xlu1 %317  ;;  %v346_v9 = vpop.permute.xlu0 %345 }
 0x16e   : > { %v322_v11 = vadd.f32 %v318_v8, %v307_v5  ;;  %v351_v12 = vadd.f32 %v346_v9, %v336_v7  ;;  %v935_v9 = vmul.f32 %v934_v4, %v1737_v51 }
 0x16f   : > { %825 = vrot.lane.b32.xlu0 %v821_v40, %s1406_s5  ;;  %797 = vrot.lane.b32.xlu1 %v792_v10, %s2165_s29  ;;  %v906_v40 = vmul.f32 %v904_v39, %v1739_v52 }
 0x170   : > { %v360_v14 = vadd.f32 %v1700_v32, %v351_v12 }
 0x171   : > { %v333_v41 = vpop.permute.xlu1 %332  ;;  %v370_v15 = vpop.permute.xlu0 %369 }
 0x172   : > { %v337_v19 = vadd.f32 %v333_v41, %v322_v11  ;;  %v375_v31 = vadd.f32 %v370_v15, %v360_v14  ;;  %v921_v14 = vmul.f32 %v919_v29, %v1739_v52 }
 0x173   : > { %840 = vrot.lane.b32.xlu0 %v836_v16, %s1407_s20  ;;  %812 = vrot.lane.b32.xlu1 %v807_v17, %s2166_s8 }
 0x175   : > { %v348_v20 = vpop.permute.xlu1 %347  ;;  %v385_v32 = vpop.permute.xlu0 %384 }
 0x176   : > { %v352_v45 = vadd.f32 %v348_v20, %v337_v19  ;;  %v390_v36 = vadd.f32 %v385_v32, %v375_v31 }
 0x177   : > { %864 = vrot.lane.b32.xlu0 %v860_v21, %s2167_s2  ;;  %827 = vrot.lane.b32.xlu1 %v822_v22, %s1406_s5 }
 0x178   : > { %v361_v24 = vadd.f32 %v1710_v38, %v352_v45  ;;  %v890_v38 = vmul.f32 %v889_v30, %v1737_v51  ;;  %v936_v51 = vmul.f32 %v934_v4, %v1739_v52 }
 0x179   : > { %v372_v26 = vpop.permute.xlu1 %371  ;;  %v400_v27 = vpop.permute.xlu0 %399 }
 0x17a   : > { %v405_v46 = vadd.f32 %v400_v27, %v390_v36  ;;  %v376_v54 = vadd.f32 %v372_v26, %v361_v24 }
 0x17b   : > { %879 = vrot.lane.b32.xlu0 %v875_v28, %s2168_s9  ;;  %842 = vrot.lane.b32.xlu1 %v837_v42, %s1407_s20 }
 0x17d   : > { %v387_v34 = vpop.permute.xlu1 %386  ;;  %v415_v25 = vpop.permute.xlu0 %414 }
 0x17e   : > { %v420_v50 = vadd.f32 %v415_v25, %v405_v46  ;;  %v391_v2 = vadd.f32 %v387_v34, %v376_v54 }
 0x17f   : > { %894 = vrot.lane.b32.xlu0 %v890_v38, %s2165_s29  ;;  %866 = vrot.lane.b32.xlu1 %v861_v35, %s2167_s2 }
 0x181   : > { %v402_v33 = vpop.permute.xlu1 %401  ;;  %v430_v43 = vpop.permute.xlu0 %429 }
 0x182   : > { %v435_v37 = vadd.f32 %v430_v43, %v420_v50  ;;  %v406_v5 = vadd.f32 %v402_v33, %v391_v2 }
 0x183   : > { %909 = vrot.lane.b32.xlu0 %v905_v48, %s2166_s8  ;;  %881 = vrot.lane.b32.xlu1 %v876_v49, %s2168_s9 }
 0x185   : > { %v417_v55 = vpop.permute.xlu1 %416  ;;  %v445_v44 = vpop.permute.xlu0 %444 }
 0x186   : > { %v450_v3 = vadd.f32 %v445_v44, %v435_v37  ;;  %v421_v10 = vadd.f32 %v417_v55, %v406_v5 }
 0x187   : > { %924 = vrot.lane.b32.xlu0 %v920_v56, %s1406_s5  ;;  %896 = vrot.lane.b32.xlu1 %v891_v1, %s2165_s29  ;;  %s2169_s29 = sshll.u32 %s1594_s1, 4 }
 0x188   : > { %v459_v6 = vadd.f32 %v1732_v47, %v450_v3 }
 0x189   : > { %v432_v7 = vpop.permute.xlu1 %431  ;;  %v469_v8 = vpop.permute.xlu0 %468 }
 0x18a   : > { %v436_v11 = vadd.f32 %v432_v7, %v421_v10  ;;  %v474_v17 = vadd.f32 %v469_v8, %v459_v6 }
 0x18b   : > { %939 = vrot.lane.b32.xlu0 %v935_v9, %s1407_s20  ;;  %911 = vrot.lane.b32.xlu1 %v906_v40, %s2166_s8 }
 0x18d   : > { %v447_v12 = vpop.permute.xlu1 %446  ;;  %v484_v13 = vpop.permute.xlu0 %483 }
 0x18e   : > { %v451_v41 = vadd.f32 %v447_v12, %v436_v11  ;;  %v489_v20 = vadd.f32 %v484_v13, %v474_v17 }
 0x18f   : > { %926 = vrot.lane.b32.xlu1 %v921_v14, %s1406_s5  ;;  %s1108_s5 = sshll.u32 %s1381_s16, 3 }
 0x190   : > { %v460_v47 = vadd.f32 %v1742_v53, %v451_v41  ;;  %s973_s8 = sadd.s32 %s1108_s5, %s1107_s24 }
 0x191   : > { %v471_v15 = vpop.permute.xlu1 %470  ;;  %v499_v16 = vpop.permute.xlu0 %498  ;;  %s1109_s9 = sshll.u32 %s973_s8, 7 }
 0x192   : > { %v504_v32 = vadd.f32 %v499_v16, %v489_v20  ;;  %v475_v23 = vadd.f32 %v471_v15, %v460_v47  ;;  %s2071_s30 = scalar_lea.hbm %s2129_s3, %s1109_s9 }
 0x193   : > { %941 = vrot.lane.b32.xlu1 %v936_v51, %s1407_s20  ;;  %s231_s20 = scalar_lea.vmem [#allocation10], %s2169_s29 }
 0x194   : > { %s976_s2 = sshll.u32 %s231_s20, 4  ;;  %s2065_s2 = int_to_ptr.vmem [resolvable:$true] %s976_s2 }
 0x195   : > { %v486_v18 = vpop.permute.xlu1 %485  ;;  %v514_v19 = vpop.permute.xlu0 %513  ;;  %s1287_s0 = scalar_lea.vmem %s2065_s2, 256  ;;  %p1294_p9 = scmp.lt.s32.totalorder %s2065_s2, %s1292_s6 }
 0x196   : > { %v519_v45 = vadd.f32 %v514_v19, %v504_v32  ;;  %v490_v28 = vadd.f32 %v486_v18, %v475_v23  ;;  %p1288_p12 = scmp.ne.s32.totalorder %s2065_s2, %s1287_s0  ;;  %p1295_p3 = scmp.lt.s32.totalorder %s1293_s23, %s1287_s0 }
 0x198   : > { %p1289_p4 = pnand %p1288_p12, %p2170_p10  ;;  %p1296_p7 = por %p1295_p3, %p1294_p9 }
 0x199   : > { %v501_v21 = vpop.permute.xlu1 %500  ;;  %v529_v22 = vpop.permute.xlu0 %528 }
 0x19a   : > { %v534_v24 = vadd.f32 %v529_v22, %v519_v45  ;;  %v505_v42 = vadd.f32 %v501_v21, %v490_v28  ;;  %p1290_p6 = pneg %p1289_p4 }
 0x19c   : > { %p1297_p8 = pnand %p1296_p7, %p1290_p6 }
 0x19d   : > { %v516_v26 = vpop.permute.xlu1 %515  ;;  %v544_v27 = vpop.permute.xlu0 %543 }
 0x19e   : > { %v549_v53 = vadd.f32 %v544_v27, %v534_v24  ;;  %v520_v34 = vadd.f32 %v516_v26, %v505_v42 }
 0x1a0   : > { %v558_v30 = vadd.f32 %v1748_v57, %v549_v53 }
 0x1a1   : > { %v531_v52 = vpop.permute.xlu1 %530  ;;  %v568_v31 = vpop.permute.xlu0 %567 }
 0x1a2   : > { %v535_v25 = vadd.f32 %v531_v52, %v520_v34  ;;  %v573_v43 = vadd.f32 %v568_v31, %v558_v30 }
 0x1a5   : > { %v546_v38 = vpop.permute.xlu1 %545  ;;  %v583_v35 = vpop.permute.xlu0 %582 }
 0x1a6   : > { %v550_v36 = vadd.f32 %v546_v38, %v535_v25  ;;  %v588_v50 = vadd.f32 %v583_v35, %v573_v43 }
 0x1a8   : > { %v559_v39 = vadd.f32 %v1751_v58, %v550_v36 }
 0x1a9   : > { %v570_v46 = vpop.permute.xlu1 %569  ;;  %v598_v33 = vpop.permute.xlu0 %597 }
 0x1aa   : > { %v603_v29 = vadd.f32 %v598_v33, %v588_v50  ;;  %v574_v57 = vadd.f32 %v570_v46, %v559_v39 }
 0x1ad   : > { %v585_v48 = vpop.permute.xlu1 %584  ;;  %v613_v49 = vpop.permute.xlu0 %612 }
 0x1ae   : > { %v618_v55 = vadd.f32 %v613_v49, %v603_v29  ;;  %v589_v2 = vadd.f32 %v585_v48, %v574_v57 }
 0x1b1   : > { %v600_v54 = vpop.permute.xlu1 %599  ;;  %v628_v37 = vpop.permute.xlu0 %627 }
 0x1b2   : > { %v633_v44 = vadd.f32 %v628_v37, %v618_v55  ;;  %v604_v4 = vadd.f32 %v600_v54, %v589_v2 }
 0x1b5   : > { %v615_v56 = vpop.permute.xlu1 %614  ;;  %v643_v1 = vpop.permute.xlu0 %642 }
 0x1b6   : > { %v648_v3 = vadd.f32 %v643_v1, %v633_v44  ;;  %v619_v7 = vadd.f32 %v615_v56, %v604_v4 }
 0x1b8   : > { %v657_v5 = vadd.f32 %v1756_v59, %v648_v3 }
 0x1b9   : > { %v630_v58 = vpop.permute.xlu1 %629  ;;  %v667_v6 = vpop.permute.xlu0 %666 }
 0x1ba   : > { %v634_v8 = vadd.f32 %v630_v58, %v619_v7  ;;  %v672_v14 = vadd.f32 %v667_v6, %v657_v5 }
 0x1bd   : > { %v645_v9 = vpop.permute.xlu1 %644  ;;  %v682_v40 = vpop.permute.xlu0 %681 }
 0x1be   : > { %v649_v10 = vadd.f32 %v645_v9, %v634_v8  ;;  %v687_v15 = vadd.f32 %v682_v40, %v672_v14 }
 0x1c0   : > { %v658_v11 = vadd.f32 %v1759_v60, %v649_v10 }
 0x1c1   : > { %v669_v12 = vpop.permute.xlu1 %668  ;;  %v697_v13 = vpop.permute.xlu0 %696 }
 0x1c2   : > { %v702_v16 = vadd.f32 %v697_v13, %v687_v15  ;;  %v673_v59 = vadd.f32 %v669_v12, %v658_v11 }
 0x1c5   : > { %v684_v41 = vpop.permute.xlu1 %683  ;;  %v712_v47 = vpop.permute.xlu0 %711 }
 0x1c6   : > { %v717_v18 = vadd.f32 %v712_v47, %v702_v16  ;;  %v688_v21 = vadd.f32 %v684_v41, %v673_v59 }
 0x1c9   : > { %v699_v51 = vpop.permute.xlu1 %698  ;;  %v727_v17 = vpop.permute.xlu0 %726 }
 0x1ca   : > { %v732_v19 = vadd.f32 %v727_v17, %v717_v18  ;;  %v703_v45 = vadd.f32 %v699_v51, %v688_v21 }
 0x1cd   : > { %v714_v20 = vpop.permute.xlu1 %713  ;;  %v742_v32 = vpop.permute.xlu0 %741 }
 0x1ce   : > { %v747_v22 = vadd.f32 %v742_v32, %v732_v19  ;;  %v718_v26 = vadd.f32 %v714_v20, %v703_v45 }
 0x1d0   : > { %v756_v23 = vadd.f32 %v1762_v61, %v747_v22  ;;  %v1227_v22 = vld [vmem:[%s1600_s21] sm:$0xff] }
 0x1d1   : > { %v729_v60 = vpop.permute.xlu1 %728  ;;  %v766_v24 = vpop.permute.xlu0 %765 }
 0x1d2   : > { %v733_v27 = vadd.f32 %v729_v60, %v718_v26  ;;  %v771_v34 = vadd.f32 %v766_v24, %v756_v23  ;;  %v1228_v26 = vld [vmem:[%s1600_s21 + $0x8] sm:$0xff] }
 0x1d5   : > { %v744_v28 = vpop.permute.xlu1 %743  ;;  %v781_v53 = vpop.permute.xlu0 %780 }
 0x1d6   : > { %v748_v42 = vadd.f32 %v744_v28, %v733_v27  ;;  %v786_v35 = vadd.f32 %v781_v53, %v771_v34 }
 0x1d8   : > { %v757_v30 = vadd.f32 %v1765_v62, %v748_v42 }
 0x1d9   : > { %v768_v52 = vpop.permute.xlu1 %767  ;;  %v796_v31 = vpop.permute.xlu0 %795 }
 0x1da   : > { %v801_v36 = vadd.f32 %v796_v31, %v786_v35  ;;  %v772_v61 = vadd.f32 %v768_v52, %v757_v30 }
 0x1dd   : > { %v783_v25 = vpop.permute.xlu1 %782  ;;  %v811_v38 = vpop.permute.xlu0 %810 }
 0x1de   : > { %v816_v33 = vadd.f32 %v811_v38, %v801_v36  ;;  %v787_v50 = vadd.f32 %v783_v25, %v772_v61 }
 0x1e1   : > { %v798_v39 = vpop.permute.xlu1 %797  ;;  %v826_v46 = vpop.permute.xlu0 %825 }
 0x1e2   : > { %v831_v43 = vadd.f32 %v826_v46, %v816_v33  ;;  %v802_v54 = vadd.f32 %v798_v39, %v787_v50 }
 0x1e5   : > { %v813_v48 = vpop.permute.xlu1 %812  ;;  %v841_v49 = vpop.permute.xlu0 %840 }
 0x1e6   : > { %v846_v29 = vadd.f32 %v841_v49, %v831_v43  ;;  %v817_v57 = vadd.f32 %v813_v48, %v802_v54 }
 0x1e8   : > { %v855_v37 = vadd.f32 %v1771_v63, %v846_v29 }
 0x1e9   : > { %v828_v62 = vpop.permute.xlu1 %827  ;;  %v865_v55 = vpop.permute.xlu0 %864 }
 0x1ea   : > { %v832_v44 = vadd.f32 %v828_v62, %v817_v57  ;;  %v870_v58 = vadd.f32 %v865_v55, %v855_v37 }
 0x1ed   : > { %v843_v56 = vpop.permute.xlu1 %842  ;;  %v880_v1 = vpop.permute.xlu0 %879 }
 0x1ee   : > { %v847_v2 = vadd.f32 %v843_v56, %v832_v44  ;;  %v885_v8 = vadd.f32 %v880_v1, %v870_v58 }
 0x1f0   : > { %v856_v3 = vadd.f32 %v1774_v0, %v847_v2 }
 0x1f1   : > { %v867_v4 = vpop.permute.xlu1 %866  ;;  %v895_v5 = vpop.permute.xlu0 %894 }
 0x1f2   : > { %v900_v9 = vadd.f32 %v895_v5, %v885_v8  ;;  %v871_v63 = vadd.f32 %v867_v4, %v856_v3 }
 0x1f5   : > { %v882_v6 = vpop.permute.xlu1 %881  ;;  %v910_v7 = vpop.permute.xlu0 %909 }
 0x1f6   : > { %v915_v11 = vadd.f32 %v910_v7, %v900_v9  ;;  %v886_v41 = vadd.f32 %v882_v6, %v871_v63 }
 0x1f9   : > { %v897_v40 = vpop.permute.xlu1 %896  ;;  %v925_v10 = vpop.permute.xlu0 %924 }
 0x1fa   : > { %v930_v12 = vadd.f32 %v925_v10, %v915_v11  ;;  %v901_v15 = vadd.f32 %v897_v40, %v886_v41 }
 0x1fd   : > { %v912_v13 = vpop.permute.xlu1 %911  ;;  %v940_v14 = vpop.permute.xlu0 %939 }
 0x1fe   : > { %v945_v47 = vadd.f32 %v940_v14, %v930_v12  ;;  %v916_v51 = vadd.f32 %v912_v13, %v901_v15 }
 0x200   : > { %v947_v0 = vmul.f32 0.5, %v945_v47 }
 0x201   : > { %v927_v16 = vpop.permute.xlu1 %926 }
 0x202   : > { %1223 = vtanh.f32 %v947_v0  ;;  %v931_v17 = vadd.f32 %v927_v16, %v916_v51 }
 0x205   : > { %v942_v18 = vpop.permute.xlu1 %941 }
 0x206   : > { %v946_v59 = vadd.f32 %v942_v18, %v931_v17 }
 0x208   : > { %v948_v19 = vmul.f32 0.5, %v946_v59 }
 0x20a   : > { %1225 = vtanh.f32 %v948_v19 }
 0x20c   : > { %v1224_v20 = vpop.eup %1223 }
 0x20d   : > { %v951_v32 = vadd.f32 1.0, %v1224_v20 }
 0x20f   : > { %v953_v21 = vmul.f32 0.5, %v951_v32 }
 0x211   : > { %v955_v45 = vmul.f32 %v1227_v22, %v953_v21 }
 0x213   : > { %958 = vst.msk [vmem:[%s231_s20] sm:$0xff] %vm957_vm3, %v955_v45 }
 0x214   : > { %v1226_v23 = vpop.eup %1225 }
 0x215   : > { %v952_v60 = vadd.f32 1.0, %v1226_v23 }
 0x217   : > { %v954_v24 = vmul.f32 0.5, %v952_v60 }
 0x219   : > { %v956_v27 = vmul.f32 %v1228_v26, %v954_v24 }
 0x21b   : > { %959 = vst.msk [vmem:[%s231_s20 + $0x8] sm:$0xff] %vm957_vm3, %v956_v27 }
 0x21c   : > { %1300 = shalt.err (!%p1297_p8)
}
 0x21d   : > { %s1301_s21 = scalar_lea.hbm %s2071_s30, 256  ;;  %s1305_s17 = scalar_lea.hbm %s2129_s3, 2048 }
 0x21e   : > { %p1302_p5 = scmp.ne.s32.totalorder %s2071_s30, %s1301_s21  ;;  %p1306_p0 = scmp.lt.u32.totalorder %s2071_s30, %s2129_s3 }
 0x21f   : > { %p1307_p2 = scmp.lt.u32.totalorder %s1305_s17, %s1301_s21  ;;  %p1309_p12 = scmp.lt.u32.totalorder %s1301_s21, %s2071_s30 }
 0x220   : > { %p1303_p11 = pnand %p1302_p5, %p2170_p10 }
 0x221   : > { %p1308_p1 = por %p1307_p2, %p1306_p0 }
 0x222   : > { %p1304_p13 = pneg %p1303_p11 }
 0x223   : > { %p1310_p4 = por %p1309_p12, %p1308_p1 }
 0x225   : > { %p1311_p6 = pnand %p1310_p4, %p1304_p13 }
 0x227   : > { %1314 = shalt.err (!%p1311_p6)
}
 0x228   : > { %s1409_s24 = smov 128   ;;  %s1410_s5 = smov 8  }
 0x229   : > { %1122 = dma.vmem_to_hbm [thread:$0]  (%p2170_p10), %s2065_s2, 256, %s2071_s30, %s961_s22, %s1409_s24, %s1409_s24, %s1410_s5  }
 0x22a PF: > { %p1144_p9 = scmp.ge.s32.totalorder %s1393_s19, 2  ;;  %s991_s29 = sand.u32 1, %s1365_s12  }
 0x22b   : > { %p2171_p3 = scmp.ne.s32.totalorder %s2153_s26, 0  ;;  %s992_s20 = scalar_lea.sflag [#allocation5], %s991_s29 }
 0x22d   : > { %p1136_p7 = pnand %p1144_p9, %p2171_p3 }
 0x22f   : > { %1360 = dma.done.wait (!%p1136_p7), %s992_s20, 256  }
 0x230   : > { %1362 = vsyncadd (!%p1136_p7), %s992_s20, 4294967040  ;;  %s21_s19 = sadd.s32 1, %s1393_s19   ;;  %s2172_s15 = sld [smem:[#allocation15_spill]] }
 0x231   : > { %p18_p8 = scmp.ge.s32.totalorder %s21_s19, 10   ;;  %s2173_s17 = sld [smem:[#allocation16_spill]] }
 0x232   : > { %s2174_s25 = sld [smem:[#allocation17_spill]]  ;;  %s2175_s12 = smov %s1369_s13 }
 0x233   : > { %s2176_s13 = smov %s1373_s14  ;;  %s2177_s14 = smov %s1561_s28 }
 0x234   : > { %s2178_s16 = smov %s1389_s18  ;;  %20 = sbr.rel (!%p18_p8) target bundleno = 13 (0xd), region = 87 }
 0x238   : > { %s2179_s18 = smov %s2174_s25 }
 0x23b   :  { %997 = vsyncpa [#allocation4], 1 }
 0x23c   :  { %999 = vsyncpa [#allocation4 + $0x1], 1 }
 0x23d   :  { %1000 = vsyncpa [#allocation5], 1 }
 0x23e   :  { %1002 = vsyncpa [#allocation5 + $0x1], 1 }
 0x23f   :  { %1003 = vsyncpa [#allocation6], 1 }
 0x240   :  { %1005 = vsyncpa [#allocation6 + $0x1], 1 }
 0x241   :  { %1006 = vsyncpa [#allocation7], 1 }
 0x242   :  { %1008 = vsyncpa [#allocation7 + $0x1], 1 }

</bundles_post_ra>
